<compile_context>
chip_gen: v5e
topology: v5e:2x2
jax: 0.10.0
libtpu: 0.0.40
codegen_flags: <defaults>
</compile_context>

<pallas_src>
import jax
import jax.numpy as jnp
from jax import lax
from jax.experimental import pallas as pl
from jax.experimental.pallas import tpu as pltpu


def _round_up(a, b):
    return (a + b - 1) // b * b


# ---------------------------------------------------------------------------
# Kernel 1: fused  x @ W1 (bf16, f32 acc)  ->  ReLU  ->  BN1 scale/shift
#           ->  per-M-tile segment-sum pool.
# grid = (M_pad // tm, K_pad // tk);  M parallel, K reduction (innermost).
# output: partial pooled sums  [num_m_tiles, G_pad, H1]  (f32).
# ---------------------------------------------------------------------------
def _lin1_pool_kernel(x_ref, w_ref, scale_ref, shift_ref, seg_ref,
                      o_ref, acc_ref):
    k = pl.program_id(1)

    @pl.when(k == 0)
    def _():
        acc_ref[...] = jnp.zeros_like(acc_ref)

    acc_ref[...] += jnp.dot(x_ref[...], w_ref[...],
                            preferred_element_type=jnp.float32)

    @pl.when(k == pl.num_programs(1) - 1)
    def _():
        # ReLU + folded BatchNorm (eval) epilogue in f32.
        h = jnp.maximum(acc_ref[...], 0.0) * scale_ref[...] + shift_ref[...]
        # Build the (G_pad, tm) 0/1 segment mask in-kernel from batch ids.
        g_pad, tm = o_ref.shape[0], h.shape[0]
        gid = lax.broadcasted_iota(jnp.int32, (g_pad, tm), 0)
        mask = (gid == seg_ref[...]).astype(jnp.float32)        # (G_pad, tm)
        # Partial pooled SUM for this M tile (f32 accumulation).
        o_ref[...] = jnp.dot(mask, h, preferred_element_type=jnp.float32)


def fused_linear1_pool(x_bf16, w1_bf16, scale1, shift1, seg2d, *, g_pad, tm, tk):
    m_pad, k_pad = x_bf16.shape
    h1 = w1_bf16.shape[1]
    n_m, n_k = m_pad // tm, k_pad // tk
    return pl.pallas_call(
        _lin1_pool_kernel,
        out_shape=jax.ShapeDtypeStruct((n_m, g_pad, h1), jnp.float32),
        grid_spec=pltpu.PrefetchScalarGridSpec(
            num_scalar_prefetch=0,
            grid=(n_m, n_k),
            in_specs=[
                pl.BlockSpec((tm, tk), lambda m, k: (m, k)),     # x tile
                pl.BlockSpec((tk, h1), lambda m, k: (k, 0)),     # W1 slab
                pl.BlockSpec((1, h1), lambda m, k: (0, 0)),      # BN scale
                pl.BlockSpec((1, h1), lambda m, k: (0, 0)),      # BN shift
                pl.BlockSpec((1, tm), lambda m, k: (0, m)),      # batch ids
            ],
            out_specs=pl.BlockSpec((None, g_pad, h1), lambda m, k: (m, 0, 0)),
            scratch_shapes=[pltpu.VMEM((tm, h1), jnp.float32)],  # per-tile K-accumulator
        ),
        compiler_params=pltpu.CompilerParams(
            dimension_semantics=("parallel", "arbitrary")),
    )(x_bf16, w1_bf16, scale1, shift1, seg2d)


# ---------------------------------------------------------------------------
# Kernel 2: fused tail.
#   pooled = pooled_sum * (1/count)
#   h2     = BN2(ReLU(pooled @ W2))        (bf16 matmul, f32 epilogue)
#   out    = h2 @ W3_pad + b3_pad          (lane-dense 128-wide output)
# ---------------------------------------------------------------------------
def _tail_kernel(p_ref, invc_ref, w2_ref, s2_ref, t2_ref, w3_ref, b3_ref, o_ref):
    pooled = p_ref[...] * invc_ref[...]                          # (G_pad, H1) f32
    z2 = jnp.dot(pooled.astype(w2_ref.dtype), w2_ref[...],
                 preferred_element_type=jnp.float32)             # (G_pad, H2)
    h2 = jnp.maximum(z2, 0.0) * s2_ref[...] + t2_ref[...]
    out = jnp.dot(h2, w3_ref[...], preferred_element_type=jnp.float32)
    o_ref[...] = (out + b3_ref[...]).astype(o_ref.dtype)


def fused_tail(pooled_sum, inv_counts, w2_bf16, scale2, shift2, w3, b3):
    g_pad, h1 = pooled_sum.shape
    h2 = w2_bf16.shape[1]
    n_pad = w3.shape[1]
    return pl.pallas_call(
        _tail_kernel,
        out_shape=jax.ShapeDtypeStruct((g_pad, n_pad), jnp.float32),
        grid_spec=pltpu.PrefetchScalarGridSpec(
            num_scalar_prefetch=0,
            grid=(1,),
            in_specs=[
                pl.BlockSpec((g_pad, h1), lambda i: (0, 0)),
                pl.BlockSpec((g_pad, 1), lambda i: (0, 0)),
                pl.BlockSpec((h1, h2), lambda i: (0, 0)),
                pl.BlockSpec((1, h2), lambda i: (0, 0)),
                pl.BlockSpec((1, h2), lambda i: (0, 0)),
                pl.BlockSpec((h2, n_pad), lambda i: (0, 0)),
                pl.BlockSpec((1, n_pad), lambda i: (0, 0)),
            ],
            out_specs=pl.BlockSpec((g_pad, n_pad), lambda i: (0, 0)),
        ),
        compiler_params=pltpu.CompilerParams(
            dimension_semantics=("arbitrary",)),
    )(pooled_sum, inv_counts, w2_bf16, scale2, shift2, w3, b3)


# ---------------------------------------------------------------------------
# Full Avg_Pool_ED forward (eval mode).
# ---------------------------------------------------------------------------
def avg_pool_ed_forward(x, batch, num_graphs, params, *, tm=256, tk=512):
    f32 = jnp.float32
    m, k = x.shape
    h1 = params["W1"].shape[1]
    h2 = params["W2"].shape[1]
    n_out = params["W3"].shape[1]

    # Fold BatchNorm1d (eval, eps=0.1) into per-feature scale/shift.
    def bn_fold(gamma, beta, mean, var, eps=0.1):
        s = gamma / jnp.sqrt(var + eps)
        return s, beta - mean * s

    s1, t1 = bn_fold(params["bn1_gamma"], params["bn1_beta"],
                     params["bn1_mean"], params["bn1_var"])
    s2, t2 = bn_fold(params["bn2_gamma"], params["bn2_beta"],
                     params["bn2_mean"], params["bn2_var"])

    # Per-graph counts without a dense one-hot; pad G to a multiple of 8
    # so the pooled accumulator / tail output are sublane-aligned.
    g_pad = _round_up(max(num_graphs, 1), 8)
    counts = jnp.zeros((g_pad,), f32).at[batch].add(1.0)
    inv_counts = (1.0 / jnp.maximum(counts, 1.0)).reshape(g_pad, 1)

    # Tile sizes: large 256-aligned K slabs; M tiles are a multiple of 128
    # (or the whole padded M if it is small).  Remainders are zero-padded.
    if m > tm:
        tm_eff = tm
        assert tm_eff % 128 == 0
    else:
        tm_eff = _round_up(m, 16)
    tk_eff = min(tk, _round_up(k, 256))
    m_pad = _round_up(m, tm_eff)
    k_pad = _round_up(k, tk_eff)

    # bf16 operands for the MXU (f32 accumulation inside the kernel).
    x_bf = x.astype(jnp.bfloat16)
    if (m_pad, k_pad) != (m, k):
        x_bf = jnp.pad(x_bf, ((0, m_pad - m), (0, k_pad - k)))
    w1_bf = params["W1"].astype(jnp.bfloat16)
    if k_pad != k:
        w1_bf = jnp.pad(w1_bf, ((0, k_pad - k), (0, 0)))
    seg = batch.astype(jnp.int32)
    if m_pad != m:
        seg = jnp.pad(seg, (0, m_pad - m), constant_values=-1)   # padded rows match no graph
    seg2d = seg.reshape(1, m_pad)

    pooled_parts = fused_linear1_pool(
        x_bf, w1_bf,
        s1.reshape(1, h1).astype(f32), t1.reshape(1, h1).astype(f32),
        seg2d, g_pad=g_pad, tm=tm_eff, tk=tk_eff)                # (n_m, G_pad, H1)
    pooled_sum = jnp.sum(pooled_parts, axis=0)                   # (G_pad, H1), tiny

    # Pad the 10-wide final output to lane-dense 128 columns.
    n_pad = _round_up(n_out, 128)
    w3 = params["W3"].astype(f32)
    b3 = params["b3"].astype(f32)
    if n_pad != n_out:
        w3 = jnp.pad(w3, ((0, 0), (0, n_pad - n_out)))
        b3 = jnp.pad(b3, (0, n_pad - n_out))

    out_pad = fused_tail(
        pooled_sum, inv_counts, params["W2"].astype(jnp.bfloat16),
        s2.reshape(1, h2).astype(f32), t2.reshape(1, h2).astype(f32),
        w3, b3.reshape(1, n_pad))
    return {"A2": out_pad[:num_graphs, :n_out]}


if __name__ == "__main__":
    # Small synthetic shapes consistent with the module's structure.
    N_NODES, IN_FEATURES = 64, 256          # real module default: in_features=16928
    H1, H2, OUT = 512, 256, 10              # real module: 2048, 1024, 10
    NUM_GRAPHS = 4

    key = jax.random.PRNGKey(0)
    ks = jax.random.split(key, 12)

    x = jax.random.normal(ks[0], (N_NODES, IN_FEATURES), dtype=jnp.float32)
    batch = jnp.repeat(jnp.arange(NUM_GRAPHS, dtype=jnp.int32),
                       N_NODES // NUM_GRAPHS)

    params = {
        "W1": jax.random.normal(ks[1], (IN_FEATURES, H1), jnp.float32) * 0.05,
        "bn1_gamma": jax.random.uniform(ks[2], (H1,), jnp.float32, 0.5, 1.5),
        "bn1_beta": jax.random.normal(ks[3], (H1,), jnp.float32) * 0.1,
        "bn1_mean": jax.random.normal(ks[4], (H1,), jnp.float32) * 0.1,
        "bn1_var": jax.random.uniform(ks[5], (H1,), jnp.float32, 0.5, 1.5),
        "W2": jax.random.normal(ks[6], (H1, H2), jnp.float32) * 0.05,
        "bn2_gamma": jax.random.uniform(ks[7], (H2,), jnp.float32, 0.5, 1.5),
        "bn2_beta": jax.random.normal(ks[8], (H2,), jnp.float32) * 0.1,
        "bn2_mean": jax.random.normal(ks[9], (H2,), jnp.float32) * 0.1,
        "bn2_var": jax.random.uniform(ks[10], (H2,), jnp.float32, 0.5, 1.5),
        "W3": jax.random.normal(ks[11], (H2, OUT), jnp.float32) * 0.05,
        "b3": jnp.linspace(-0.5, 0.5, OUT).astype(jnp.float32),
    }

    fwd = jax.jit(avg_pool_ed_forward, static_argnames=("num_graphs",))
    out = fwd(x, batch, num_graphs=NUM_GRAPHS, params=params)
    a2 = jax.block_until_ready(out["A2"])

    # Pure-JAX f32 reference (eval-mode semantics).
    def ref_forward():
        s1 = params["bn1_gamma"] / jnp.sqrt(params["bn1_var"] + 0.1)
        t1 = params["bn1_beta"] - params["bn1_mean"] * s1
        s2 = params["bn2_gamma"] / jnp.sqrt(params["bn2_var"] + 0.1)
        t2 = params["bn2_beta"] - params["bn2_mean"] * s2
        h1 = jnp.maximum(x @ params["W1"], 0.0) * s1 + t1
        oh = jax.nn.one_hot(batch, NUM_GRAPHS, dtype=jnp.float32).T
        pooled = (oh @ h1) / jnp.sum(oh, axis=1, keepdims=True)
        h2 = jnp.maximum(pooled @ params["W2"], 0.0) * s2 + t2
        return h2 @ params["W3"] + params["b3"]

    ref = ref_forward()
    assert a2.shape == (NUM_GRAPHS, OUT)
    err = jnp.max(jnp.abs(a2 - ref))
    # bf16 MXU operands (f32 accumulation) => looser tolerance than pure f32.
    assert jnp.allclose(a2, ref, rtol=2e-2, atol=2e-2), f"max abs err {err}"
    print("KERNEL_OK")
</pallas_src>

<mosaic_0001>
module attributes {stable_mosaic.version = 11 : i64} {
  func.func @_lin1_pool_kernel(%arg0: i32, %arg1: i32, %arg2: memref<64x256xbf16, #tpu.memory_space<vmem>>, %arg3: memref<256x512xbf16, #tpu.memory_space<vmem>>, %arg4: memref<1x512xf32, #tpu.memory_space<vmem>>, %arg5: memref<1x512xf32, #tpu.memory_space<vmem>>, %arg6: memref<1x64xi32, #tpu.memory_space<vmem>>, %arg7: memref<1x8x512xf32, #tpu.memory_space<vmem>>, %arg8: memref<64x512xf32, #tpu.memory_space<vmem>>) attributes {dimension_semantics = [#tpu.dimension_semantics<parallel>, #tpu.dimension_semantics<arbitrary>], iteration_bounds = array<i64: 1, 1>, scalar_prefetch = 0 : i64, scratch_operands = 1 : i64, tpu.core_type = #tpu.core_type<tc>, window_params = [{transform_indices = @transform_0, window_bounds = array<i64: 64, 256>}, {transform_indices = @transform_1, window_bounds = array<i64: 256, 512>}, {pipeline_mode = #tpu.pipeline_mode<synchronous>, transform_indices = @transform_2, window_bounds = array<i64: 1, 512>}, {pipeline_mode = #tpu.pipeline_mode<synchronous>, transform_indices = @transform_3, window_bounds = array<i64: 1, 512>}, {transform_indices = @transform_4, window_bounds = array<i64: 1, 64>}, {transform_indices = @transform_5, window_bounds = array<i64: 1, 8, 512>}]} {
    %c0_i32 = arith.constant 0 : i32
    %0 = arith.cmpi eq, %arg1, %c0_i32 : i32
    %1 = arith.extui %0 : i1 to i32
    %c0_i32_0 = arith.constant 0 : i32
    %2 = arith.cmpi ne, %1, %c0_i32_0 : i32
    scf.if %2 {
      %cst_10 = arith.constant 0.000000e+00 : f32
      %12 = vector.broadcast %cst_10 : f32 to vector<64x512xf32>
      %c0_11 = arith.constant 0 : index
      %c0_12 = arith.constant 0 : index
      %13 = vector.load %arg8[%c0_11, %c0_12] : memref<64x512xf32, #tpu.memory_space<vmem>>, vector<64x512xf32>
      tpu.vector_store %arg8[%c0_11, %c0_12], %12 {strides = array<i32>} : memref<64x512xf32, #tpu.memory_space<vmem>>, vector<64x512xf32>,
    } else {
    }
    %c0 = arith.constant 0 : index
    %c0_1 = arith.constant 0 : index
    %3 = vector.load %arg8[%c0, %c0_1] : memref<64x512xf32, #tpu.memory_space<vmem>>, vector<64x512xf32>
    %c0_2 = arith.constant 0 : index
    %c0_3 = arith.constant 0 : index
    %4 = vector.load %arg2[%c0_2, %c0_3] : memref<64x256xbf16, #tpu.memory_space<vmem>>, vector<64x256xbf16>
    %c0_4 = arith.constant 0 : index
    %c0_5 = arith.constant 0 : index
    %5 = vector.load %arg3[%c0_4, %c0_5] : memref<256x512xbf16, #tpu.memory_space<vmem>>, vector<256x512xbf16>
    %cst = arith.constant dense<0.000000e+00> : vector<64x512xf32>
    %6 = tpu.matmul %4, %5, %cst {dimension_numbers = #tpu.dot_dimension_numbers<[1], [0], [0], [1], [0, 0, 1, 1], [], []>} : vector<64x256xbf16>, vector<256x512xbf16>, vector<64x512xf32> -> vector<64x512xf32>
    %7 = arith.addf %3, %6 : vector<64x512xf32>
    %c0_6 = arith.constant 0 : index
    %c0_7 = arith.constant 0 : index
    %8 = vector.load %arg8[%c0_6, %c0_7] : memref<64x512xf32, #tpu.memory_space<vmem>>, vector<64x512xf32>
    tpu.vector_store %arg8[%c0_6, %c0_7], %7 {strides = array<i32>} : memref<64x512xf32, #tpu.memory_space<vmem>>, vector<64x512xf32>,
    %c0_i32_8 = arith.constant 0 : i32
    %9 = arith.cmpi eq, %arg1, %c0_i32_8 : i32
    %10 = arith.extui %9 : i1 to i32
    %c0_i32_9 = arith.constant 0 : i32
    %11 = arith.cmpi ne, %10, %c0_i32_9 : i32
    scf.if %11 {
      %c0_10 = arith.constant 0 : index
      %c0_11 = arith.constant 0 : index
      %12 = vector.load %arg8[%c0_10, %c0_11] : memref<64x512xf32, #tpu.memory_space<vmem>>, vector<64x512xf32>
      %cst_12 = arith.constant 0.000000e+00 : f32
      %13 = vector.broadcast %cst_12 : f32 to vector<64x512xf32>
      %14 = arith.maximumf %12, %13 : vector<64x512xf32>
      %c0_13 = arith.constant 0 : index
      %c0_14 = arith.constant 0 : index
      %15 = vector.load %arg4[%c0_13, %c0_14] : memref<1x512xf32, #tpu.memory_space<vmem>>, vector<1x512xf32>
      %16 = vector.broadcast %15 : vector<1x512xf32> to vector<64x512xf32>
      %17 = arith.mulf %14, %16 : vector<64x512xf32>
      %c0_15 = arith.constant 0 : index
      %c0_16 = arith.constant 0 : index
      %18 = vector.load %arg5[%c0_15, %c0_16] : memref<1x512xf32, #tpu.memory_space<vmem>>, vector<1x512xf32>
      %19 = vector.broadcast %18 : vector<1x512xf32> to vector<64x512xf32>
      %20 = arith.addf %17, %19 : vector<64x512xf32>
      %21 = tpu.iota {dimensions = array<i32: 0>} : vector<8x64xi32>
      %c0_17 = arith.constant 0 : index
      %c0_18 = arith.constant 0 : index
      %22 = vector.load %arg6[%c0_17, %c0_18] : memref<1x64xi32, #tpu.memory_space<vmem>>, vector<1x64xi32>
      %23 = vector.broadcast %22 : vector<1x64xi32> to vector<8x64xi32>
      %24 = arith.cmpi eq, %21, %23 : vector<8x64xi32>
      %25 = arith.extui %24 : vector<8x64xi1> to vector<8x64xi32>
      %26 = arith.sitofp %25 : vector<8x64xi32> to vector<8x64xf32>
      %cst_19 = arith.constant dense<0.000000e+00> : vector<8x512xf32>
      %27 = tpu.matmul %26, %20, %cst_19 {dimension_numbers = #tpu.dot_dimension_numbers<[1], [0], [0], [1], [0, 0, 1, 1], [], []>} : vector<8x64xf32>, vector<64x512xf32>, vector<8x512xf32> -> vector<8x512xf32>
      %c0_20 = arith.constant 0 : index
      %c0_21 = arith.constant 0 : index
      %c0_22 = arith.constant 0 : index
      %28 = vector.load %arg7[%c0_20, %c0_21, %c0_22] : memref<1x8x512xf32, #tpu.memory_space<vmem>>, vector<1x8x512xf32>
      %29 = vector.shape_cast %28 : vector<1x8x512xf32> to vector<8x512xf32>
      %30 = vector.shape_cast %27 : vector<8x512xf32> to vector<1x8x512xf32>
      tpu.vector_store %arg7[%c0_20, %c0_21, %c0_22], %30 {strides = array<i32>} : memref<1x8x512xf32, #tpu.memory_space<vmem>>, vector<1x8x512xf32>,
    } else {
    }
    return
  }
  func.func @transform_0(%arg0: i32, %arg1: i32) -> (i32, i32) {
    %c0_i32 = arith.constant 0 : i32
    return %arg0, %arg1 : i32, i32
  }
  func.func @transform_1(%arg0: i32, %arg1: i32) -> (i32, i32) {
    %c0_i32 = arith.constant 0 : i32
    %c0_i32_0 = arith.constant 0 : i32
    return %arg1, %c0_i32 : i32, i32
  }
  func.func @transform_2(%arg0: i32, %arg1: i32) -> (i32, i32) {
    %c0_i32 = arith.constant 0 : i32
    %c0_i32_0 = arith.constant 0 : i32
    %c0_i32_1 = arith.constant 0 : i32
    return %c0_i32, %c0_i32_0 : i32, i32
  }
  func.func @transform_3(%arg0: i32, %arg1: i32) -> (i32, i32) {
    %c0_i32 = arith.constant 0 : i32
    %c0_i32_0 = arith.constant 0 : i32
    %c0_i32_1 = arith.constant 0 : i32
    return %c0_i32, %c0_i32_0 : i32, i32
  }
  func.func @transform_4(%arg0: i32, %arg1: i32) -> (i32, i32) {
    %c0_i32 = arith.constant 0 : i32
    %c0_i32_0 = arith.constant 0 : i32
    return %c0_i32, %arg0 : i32, i32
  }
  func.func @transform_5(%arg0: i32, %arg1: i32) -> (i32, i32, i32) {
    %c0_i32 = arith.constant 0 : i32
    %c0_i32_0 = arith.constant 0 : i32
    %c0_i32_1 = arith.constant 0 : i32
    return %arg0, %c0_i32, %c0_i32_0 : i32, i32, i32
  }
}

module attributes {stable_mosaic.version = 11 : i64} {
  func.func @_tail_kernel(%arg0: i32, %arg1: memref<8x512xf32, #tpu.memory_space<vmem>>, %arg2: memref<8x1xf32, #tpu.memory_space<vmem>>, %arg3: memref<512x256xbf16, #tpu.memory_space<vmem>>, %arg4: memref<1x256xf32, #tpu.memory_space<vmem>>, %arg5: memref<1x256xf32, #tpu.memory_space<vmem>>, %arg6: memref<256x128xf32, #tpu.memory_space<vmem>>, %arg7: memref<1x128xf32, #tpu.memory_space<vmem>>, %arg8: memref<8x128xf32, #tpu.memory_space<vmem>>) attributes {dimension_semantics = [#tpu.dimension_semantics<arbitrary>], iteration_bounds = array<i64: 1>, scalar_prefetch = 0 : i64, scratch_operands = 0 : i64, tpu.core_type = #tpu.core_type<tc>, window_params = [{pipeline_mode = #tpu.pipeline_mode<synchronous>, transform_indices = @transform_0, window_bounds = array<i64: 8, 512>}, {pipeline_mode = #tpu.pipeline_mode<synchronous>, transform_indices = @transform_1, window_bounds = array<i64: 8, 1>}, {pipeline_mode = #tpu.pipeline_mode<synchronous>, transform_indices = @transform_2, window_bounds = array<i64: 512, 256>}, {pipeline_mode = #tpu.pipeline_mode<synchronous>, transform_indices = @transform_3, window_bounds = array<i64: 1, 256>}, {pipeline_mode = #tpu.pipeline_mode<synchronous>, transform_indices = @transform_4, window_bounds = array<i64: 1, 256>}, {pipeline_mode = #tpu.pipeline_mode<synchronous>, transform_indices = @transform_5, window_bounds = array<i64: 256, 128>}, {pipeline_mode = #tpu.pipeline_mode<synchronous>, transform_indices = @transform_6, window_bounds = array<i64: 1, 128>}, {pipeline_mode = #tpu.pipeline_mode<synchronous>, transform_indices = @transform_7, window_bounds = array<i64: 8, 128>}]} {
    %c0 = arith.constant 0 : index
    %c0_0 = arith.constant 0 : index
    %0 = vector.load %arg1[%c0, %c0_0] : memref<8x512xf32, #tpu.memory_space<vmem>>, vector<8x512xf32>
    %c0_1 = arith.constant 0 : index
    %c0_2 = arith.constant 0 : index
    %1 = vector.load %arg2[%c0_1, %c0_2] : memref<8x1xf32, #tpu.memory_space<vmem>>, vector<8x1xf32>
    %2 = vector.broadcast %1 : vector<8x1xf32> to vector<8x512xf32>
    %3 = arith.mulf %0, %2 : vector<8x512xf32>
    %4 = arith.truncf %3 : vector<8x512xf32> to vector<8x512xbf16>
    %c0_3 = arith.constant 0 : index
    %c0_4 = arith.constant 0 : index
    %5 = vector.load %arg3[%c0_3, %c0_4] : memref<512x256xbf16, #tpu.memory_space<vmem>>, vector<512x256xbf16>
    %cst = arith.constant dense<0.000000e+00> : vector<8x256xf32>
    %6 = tpu.matmul %4, %5, %cst {dimension_numbers = #tpu.dot_dimension_numbers<[1], [0], [0], [1], [0, 0, 1, 1], [], []>} : vector<8x512xbf16>, vector<512x256xbf16>, vector<8x256xf32> -> vector<8x256xf32>
    %cst_5 = arith.constant 0.000000e+00 : f32
    %7 = vector.broadcast %cst_5 : f32 to vector<8x256xf32>
    %8 = arith.maximumf %6, %7 : vector<8x256xf32>
    %c0_6 = arith.constant 0 : index
    %c0_7 = arith.constant 0 : index
    %9 = vector.load %arg4[%c0_6, %c0_7] : memref<1x256xf32, #tpu.memory_space<vmem>>, vector<1x256xf32>
    %10 = vector.broadcast %9 : vector<1x256xf32> to vector<8x256xf32>
    %11 = arith.mulf %8, %10 : vector<8x256xf32>
    %c0_8 = arith.constant 0 : index
    %c0_9 = arith.constant 0 : index
    %12 = vector.load %arg5[%c0_8, %c0_9] : memref<1x256xf32, #tpu.memory_space<vmem>>, vector<1x256xf32>
    %13 = vector.broadcast %12 : vector<1x256xf32> to vector<8x256xf32>
    %14 = arith.addf %11, %13 : vector<8x256xf32>
    %c0_10 = arith.constant 0 : index
    %c0_11 = arith.constant 0 : index
    %15 = vector.load %arg6[%c0_10, %c0_11] : memref<256x128xf32, #tpu.memory_space<vmem>>, vector<256x128xf32>
    %cst_12 = arith.constant dense<0.000000e+00> : vector<8x128xf32>
    %16 = tpu.matmul %14, %15, %cst_12 {dimension_numbers = #tpu.dot_dimension_numbers<[1], [0], [0], [1], [0, 0, 1, 1], [], []>} : vector<8x256xf32>, vector<256x128xf32>, vector<8x128xf32> -> vector<8x128xf32>
    %c0_13 = arith.constant 0 : index
    %c0_14 = arith.constant 0 : index
    %17 = vector.load %arg7[%c0_13, %c0_14] : memref<1x128xf32, #tpu.memory_space<vmem>>, vector<1x128xf32>
    %18 = vector.broadcast %17 : vector<1x128xf32> to vector<8x128xf32>
    %19 = arith.addf %16, %18 : vector<8x128xf32>
    %c0_15 = arith.constant 0 : index
    %c0_16 = arith.constant 0 : index
    %20 = vector.load %arg8[%c0_15, %c0_16] : memref<8x128xf32, #tpu.memory_space<vmem>>, vector<8x128xf32>
    tpu.vector_store %arg8[%c0_15, %c0_16], %19 {strides = array<i32>} : memref<8x128xf32, #tpu.memory_space<vmem>>, vector<8x128xf32>,
    return
  }
  func.func @transform_0(%arg0: i32) -> (i32, i32) {
    %c0_i32 = arith.constant 0 : i32
    %c0_i32_0 = arith.constant 0 : i32
    %c0_i32_1 = arith.constant 0 : i32
    return %c0_i32, %c0_i32_0 : i32, i32
  }
  func.func @transform_1(%arg0: i32) -> (i32, i32) {
    %c0_i32 = arith.constant 0 : i32
    %c0_i32_0 = arith.constant 0 : i32
    %c0_i32_1 = arith.constant 0 : i32
    return %c0_i32, %c0_i32_0 : i32, i32
  }
  func.func @transform_2(%arg0: i32) -> (i32, i32) {
    %c0_i32 = arith.constant 0 : i32
    %c0_i32_0 = arith.constant 0 : i32
    %c0_i32_1 = arith.constant 0 : i32
    return %c0_i32, %c0_i32_0 : i32, i32
  }
  func.func @transform_3(%arg0: i32) -> (i32, i32) {
    %c0_i32 = arith.constant 0 : i32
    %c0_i32_0 = arith.constant 0 : i32
    %c0_i32_1 = arith.constant 0 : i32
    return %c0_i32, %c0_i32_0 : i32, i32
  }
  func.func @transform_4(%arg0: i32) -> (i32, i32) {
    %c0_i32 = arith.constant 0 : i32
    %c0_i32_0 = arith.constant 0 : i32
    %c0_i32_1 = arith.constant 0 : i32
    return %c0_i32, %c0_i32_0 : i32, i32
  }
  func.func @transform_5(%arg0: i32) -> (i32, i32) {
    %c0_i32 = arith.constant 0 : i32
    %c0_i32_0 = arith.constant 0 : i32
    %c0_i32_1 = arith.constant 0 : i32
    return %c0_i32, %c0_i32_0 : i32, i32
  }
  func.func @transform_6(%arg0: i32) -> (i32, i32) {
    %c0_i32 = arith.constant 0 : i32
    %c0_i32_0 = arith.constant 0 : i32
    %c0_i32_1 = arith.constant 0 : i32
    return %c0_i32, %c0_i32_0 : i32, i32
  }
  func.func @transform_7(%arg0: i32) -> (i32, i32) {
    %c0_i32 = arith.constant 0 : i32
    %c0_i32_0 = arith.constant 0 : i32
    %c0_i32_1 = arith.constant 0 : i32
    return %c0_i32, %c0_i32_0 : i32, i32
  }
}

</mosaic_0001>

<bundles_post_ra>
// kernel: avg_pool_ed_forward.3
= control target key start
LH: loop header
LB: loop body
LE: loop exit
PB: predicated region body
PF: predicated region fallthrough
CT: control target
= control target key end

     0   :  { %v954_v0 = vmov 0   ;;  %s1502_s1 = inlined_call_operand.vmem [shape: f32[8,1], index: 1, kind: input, shape index: {}]   ;;  %s1503_s2 = inlined_call_operand.vmem [shape: bf16[512,256], index: 2, kind: input, shape index: {}]   ;;  %s1504_s0 = inlined_call_operand.vmem [shape: f32[8,512], index: 0, kind: input, shape index: {}]   ;;  %s1505_s5 = inlined_call_operand.vmem [shape: f32[256,128], index: 5, kind: input, shape index: {}]   ;;  %s1506_s6 = inlined_call_operand.vmem [shape: f32[1,128], index: 6, kind: input, shape index: {}]   ;;  %s1507_s3 = inlined_call_operand.vmem [shape: f32[1,256], index: 3, kind: input, shape index: {}]   ;;  %s1508_s4 = inlined_call_operand.vmem [shape: f32[1,256], index: 4, kind: input, shape index: {}]   ;;  %s1509_s7 = inlined_call_operand.vmem [shape: f32[8,128], index: 7, kind: output, shape index: {}]  }
   0x1   :  { %952 = vset.pattern.permute.xlu0 %v954_v0  ;;  %v30_v1 = vld [vmem:[%s1502_s1] sm:$0xff]  ;;  %v689_v2 = vld [vmem:[%s1503_s2 + $0x70] sm:$0xf]  ;;  %v902_v3 = vld [vmem:[%s1503_s2 + $0x74] sm:$0xf0] }
   0x2   :  { %33 = vperm.xlu0 %952, %v30_v1   ;;  %v690_v4 = vor.u32 %v902_v3, %v689_v2  ;;  %v753_v5 = vld [vmem:[%s1503_s2 + $0xf0] sm:$0xf]  ;;  %v918_v6 = vld [vmem:[%s1503_s2 + $0xf4] sm:$0xf0]  ;;  %v681_v14 = vld [vmem:[%s1503_s2 + $0x60] sm:$0xf] }
   0x3   :  { %v817_v7 = vld [vmem:[%s1503_s2 + $0x170] sm:$0xf]  ;;  %v754_v8 = vor.u32 %v918_v6, %v753_v5  ;;  %v934_v9 = vld [vmem:[%s1503_s2 + $0x174] sm:$0xf0]  ;;  %v900_v15 = vld [vmem:[%s1503_s2 + $0x64] sm:$0xf0] }
   0x4   :  { %v881_v10 = vld [vmem:[%s1503_s2 + $0x1f0] sm:$0xf]  ;;  %v950_v11 = vld [vmem:[%s1503_s2 + $0x1f4] sm:$0xf0]  ;;  %428 = vmatpush.bf16.msra.mxu0 %v690_v4  ;;  %v818_v12 = vor.u32 %v934_v9, %v817_v7  ;;  %v745_v16 = vld [vmem:[%s1503_s2 + $0xe0] sm:$0xf]  ;;  %v682_v17 = vor.u32 %v900_v15, %v681_v14 }
   0x5   :  { %v882_v13 = vor.u32 %v950_v11, %v881_v10  ;;  %441 = vmatpush.bf16.msra.mxu1 %v754_v8  ;;  %v916_v18 = vld [vmem:[%s1503_s2 + $0xe4] sm:$0xf0]  ;;  %v809_v19 = vld [vmem:[%s1503_s2 + $0x160] sm:$0xf]  ;;  %v673_v25 = vld [vmem:[%s1503_s2 + $0x50] sm:$0xf] }
   0x6   :  { %v932_v20 = vld [vmem:[%s1503_s2 + $0x164] sm:$0xf0]  ;;  %454 = vmatpush.bf16.msra.mxu2 %v818_v12  ;;  %v746_v21 = vor.u32 %v916_v18, %v745_v16  ;;  %v873_v23 = vld [vmem:[%s1503_s2 + $0x1e0] sm:$0xf]  ;;  %v898_v27 = vld [vmem:[%s1503_s2 + $0x54] sm:$0xf0] }
   0x7   :  { %467 = vmatpush.bf16.msra.mxu3 %v882_v13  ;;  %v810_v22 = vor.u32 %v932_v20, %v809_v19  ;;  %v948_v24 = vld [vmem:[%s1503_s2 + $0x1e4] sm:$0xf0]  ;;  %v737_v28 = vld [vmem:[%s1503_s2 + $0xd0] sm:$0xf]  ;;  %v914_v29 = vld [vmem:[%s1503_s2 + $0xd4] sm:$0xf0]  ;;  %v674_v30 = vor.u32 %v898_v27, %v673_v25 }
   0x8   :  { %v874_v26 = vor.u32 %v948_v24, %v873_v23  ;;  %429 = vmatpush.bf16.msra.mxu0 %v682_v17  ;;  %v801_v31 = vld [vmem:[%s1503_s2 + $0x150] sm:$0xf]  ;;  %v930_v32 = vld [vmem:[%s1503_s2 + $0x154] sm:$0xf0]  ;;  %v738_v34 = vor.u32 %v914_v29, %v737_v28  ;;  %v665_v36 = vld [vmem:[%s1503_s2 + $0x40] sm:$0xf] }
   0x9   :  { %v865_v33 = vld [vmem:[%s1503_s2 + $0x1d0] sm:$0xf]  ;;  %442 = vmatpush.bf16.msra.mxu1 %v746_v21  ;;  %v946_v35 = vld [vmem:[%s1503_s2 + $0x1d4] sm:$0xf0]  ;;  %v896_v37 = vld [vmem:[%s1503_s2 + $0x44] sm:$0xf0]  ;;  %v802_v38 = vor.u32 %v930_v32, %v801_v31 }
   0xa   :  { %455 = vmatpush.bf16.msra.mxu2 %v810_v22  ;;  %v866_v39 = vor.u32 %v946_v35, %v865_v33  ;;  %v729_v40 = vld [vmem:[%s1503_s2 + $0xc0] sm:$0xf]  ;;  %v912_v41 = vld [vmem:[%s1503_s2 + $0xc4] sm:$0xf0]  ;;  %v666_v46 = vor.u32 %v896_v37, %v665_v36  ;;  %v657_v48 = vld [vmem:[%s1503_s2 + $0x30] sm:$0xf] }
   0xb   :  { %468 = vmatpush.bf16.msra.mxu3 %v874_v26  ;;  %v793_v42 = vld [vmem:[%s1503_s2 + $0x140] sm:$0xf]  ;;  %v928_v43 = vld [vmem:[%s1503_s2 + $0x144] sm:$0xf0]  ;;  %v730_v47 = vor.u32 %v912_v41, %v729_v40  ;;  %v894_v49 = vld [vmem:[%s1503_s2 + $0x34] sm:$0xf0] }
   0xc   :  { %v857_v44 = vld [vmem:[%s1503_s2 + $0x1c0] sm:$0xf]  ;;  %v944_v45 = vld [vmem:[%s1503_s2 + $0x1c4] sm:$0xf0]  ;;  %430 = vmatpush.bf16.msra.mxu0 %v674_v30  ;;  %v794_v50 = vor.u32 %v928_v43, %v793_v42  ;;  %v721_v52 = vld [vmem:[%s1503_s2 + $0xb0] sm:$0xf]  ;;  %v658_v58 = vor.u32 %v894_v49, %v657_v48 }
   0xd   :  { %443 = vmatpush.bf16.msra.mxu1 %v738_v34  ;;  %v858_v51 = vor.u32 %v944_v45, %v857_v44  ;;  %v910_v53 = vld [vmem:[%s1503_s2 + $0xb4] sm:$0xf0]  ;;  %v785_v54 = vld [vmem:[%s1503_s2 + $0x130] sm:$0xf]  ;;  %v649_v60 = vld [vmem:[%s1503_s2 + $0x20] sm:$0xf] }
   0xe   :  { %456 = vmatpush.bf16.msra.mxu2 %v802_v38  ;;  %v926_v55 = vld [vmem:[%s1503_s2 + $0x134] sm:$0xf0]  ;;  %v849_v56 = vld [vmem:[%s1503_s2 + $0x1b0] sm:$0xf]  ;;  %v722_v59 = vor.u32 %v910_v53, %v721_v52  ;;  %v892_v61 = vld [vmem:[%s1503_s2 + $0x24] sm:$0xf0] }
   0xf   :  { %469 = vmatpush.bf16.msra.mxu3 %v866_v39  ;;  %v942_v57 = vld [vmem:[%s1503_s2 + $0x1b4] sm:$0xf0]  ;;  %v786_v62 = vor.u32 %v926_v55, %v785_v54  ;;  %v713_v0 = vld [vmem:[%s1503_s2 + $0xa0] sm:$0xf]  ;;  %v908_v1 = vld [vmem:[%s1503_s2 + $0xa4] sm:$0xf0]  ;;  %v650_v6 = vor.u32 %v892_v61, %v649_v60 }
  0x10   :  { %431 = vmatpush.bf16.msra.mxu0 %v666_v46  ;;  %v850_v63 = vor.u32 %v942_v57, %v849_v56  ;;  %v777_v2 = vld [vmem:[%s1503_s2 + $0x120] sm:$0xf]  ;;  %v924_v3 = vld [vmem:[%s1503_s2 + $0x124] sm:$0xf0]  ;;  %v714_v7 = vor.u32 %v908_v1, %v713_v0  ;;  %v641_v8 = vld [vmem:[%s1503_s2 + $0x10] sm:$0xf] }
  0x11   :  { %444 = vmatpush.bf16.msra.mxu1 %v730_v47  ;;  %v841_v4 = vld [vmem:[%s1503_s2 + $0x1a0] sm:$0xf]  ;;  %v940_v5 = vld [vmem:[%s1503_s2 + $0x1a4] sm:$0xf0]  ;;  %v890_v9 = vld [vmem:[%s1503_s2 + $0x14] sm:$0xf0]  ;;  %v778_v10 = vor.u32 %v924_v3, %v777_v2 }
  0x12   :  { %457 = vmatpush.bf16.msra.mxu2 %v794_v50  ;;  %v842_v11 = vor.u32 %v940_v5, %v841_v4  ;;  %v705_v12 = vld [vmem:[%s1503_s2 + $0x90] sm:$0xf]  ;;  %v906_v13 = vld [vmem:[%s1503_s2 + $0x94] sm:$0xf0]  ;;  %v642_v18 = vor.u32 %v890_v9, %v641_v8  ;;  %v633_v19 = vld [vmem:[%s1503_s2] sm:$0xf] }
  0x13   :  { %470 = vmatpush.bf16.msra.mxu3 %v858_v51  ;;  %v769_v14 = vld [vmem:[%s1503_s2 + $0x110] sm:$0xf]  ;;  %v922_v15 = vld [vmem:[%s1503_s2 + $0x114] sm:$0xf0]  ;;  %v888_v20 = vld [vmem:[%s1503_s2 + $0x4] sm:$0xf0]  ;;  %v706_v21 = vor.u32 %v906_v13, %v705_v12 }
  0x14   :  { %432 = vmatpush.bf16.msra.mxu0 %v658_v58  ;;  %v833_v16 = vld [vmem:[%s1503_s2 + $0x190] sm:$0xf]  ;;  %v938_v17 = vld [vmem:[%s1503_s2 + $0x194] sm:$0xf0]  ;;  %v697_v22 = vld [vmem:[%s1503_s2 + $0x80] sm:$0xf]  ;;  %v770_v25 = vor.u32 %v922_v15, %v769_v14  ;;  %v634_v33 = vor.u32 %v888_v20, %v633_v19 }
  0x15   :  { %445 = vmatpush.bf16.msra.mxu1 %v722_v59  ;;  %v904_v23 = vld [vmem:[%s1503_s2 + $0x84] sm:$0xf0]  ;;  %v761_v24 = vld [vmem:[%s1503_s2 + $0x100] sm:$0xf]  ;;  %v834_v26 = vor.u32 %v938_v17, %v833_v16  ;;  %v901_v28 = vld [vmem:[%s1503_s2 + $0x74] sm:$0xf] }
  0x16   :  { %458 = vmatpush.bf16.msra.mxu2 %v786_v62  ;;  %v920_v27 = vld [vmem:[%s1503_s2 + $0x104] sm:$0xf0]  ;;  %v691_v29 = vld [vmem:[%s1503_s2 + $0x78] sm:$0xf0]  ;;  %v825_v30 = vld [vmem:[%s1503_s2 + $0x180] sm:$0xf]  ;;  %v698_v37 = vor.u32 %v904_v23, %v697_v22 }
  0x17   :  { %471 = vmatpush.bf16.msra.mxu3 %v850_v63  ;;  %v936_v31 = vld [vmem:[%s1503_s2 + $0x184] sm:$0xf0]  ;;  %v917_v32 = vld [vmem:[%s1503_s2 + $0xf4] sm:$0xf]  ;;  %v755_v34 = vld [vmem:[%s1503_s2 + $0xf8] sm:$0xf0]  ;;  %v694_v38 = vor.u32 %v901_v28, %v691_v29  ;;  %v762_v41 = vor.u32 %v920_v27, %v761_v24 }
  0x18   :  { %433 = vmatpush.bf16.msra.mxu0 %v650_v6  ;;  %v933_v35 = vld [vmem:[%s1503_s2 + $0x174] sm:$0xf]  ;;  %v819_v36 = vld [vmem:[%s1503_s2 + $0x178] sm:$0xf0]  ;;  %v826_v42 = vor.u32 %v936_v31, %v825_v30  ;;  %v899_v43 = vld [vmem:[%s1503_s2 + $0x64] sm:$0xf]  ;;  %v758_v45 = vor.u32 %v917_v32, %v755_v34 }
  0x19   :  { %446 = vmatpush.bf16.msra.mxu1 %v714_v7  ;;  %v949_v39 = vld [vmem:[%s1503_s2 + $0x1f4] sm:$0xf]  ;;  %v883_v40 = vld [vmem:[%s1503_s2 + $0x1f8] sm:$0xf0]  ;;  %v683_v44 = vld [vmem:[%s1503_s2 + $0x68] sm:$0xf0]  ;;  %v822_v46 = vor.u32 %v933_v35, %v819_v36 }
  0x1a   :  { %459 = vmatpush.bf16.msra.mxu2 %v778_v10  ;;  %v915_v47 = vld [vmem:[%s1503_s2 + $0xe4] sm:$0xf]  ;;  %v886_v48 = vor.u32 %v949_v39, %v883_v40  ;;  %v747_v49 = vld [vmem:[%s1503_s2 + $0xe8] sm:$0xf0]  ;;  %v686_v52 = vor.u32 %v899_v43, %v683_v44  ;;  %v897_v55 = vld [vmem:[%s1503_s2 + $0x54] sm:$0xf] }
  0x1b   :  { %472 = vmatpush.bf16.msra.mxu3 %v842_v11  ;;  %v931_v50 = vld [vmem:[%s1503_s2 + $0x164] sm:$0xf]  ;;  %v811_v51 = vld [vmem:[%s1503_s2 + $0x168] sm:$0xf0]  ;;  %v675_v56 = vld [vmem:[%s1503_s2 + $0x58] sm:$0xf0]  ;;  %v750_v57 = vor.u32 %v915_v47, %v747_v49 }
  0x1c   :  { %434 = vmatpush.bf16.msra.mxu0 %v642_v18  ;;  %v947_v53 = vld [vmem:[%s1503_s2 + $0x1e4] sm:$0xf]  ;;  %v875_v54 = vld [vmem:[%s1503_s2 + $0x1e8] sm:$0xf0]  ;;  %v814_v58 = vor.u32 %v931_v50, %v811_v51  ;;  %v913_v59 = vld [vmem:[%s1503_s2 + $0xd4] sm:$0xf]  ;;  %v678_v0 = vor.u32 %v897_v55, %v675_v56 }
  0x1d   :  { %447 = vmatpush.bf16.msra.mxu1 %v706_v21  ;;  %v878_v60 = vor.u32 %v947_v53, %v875_v54  ;;  %v739_v61 = vld [vmem:[%s1503_s2 + $0xd8] sm:$0xf0]  ;;  %v929_v62 = vld [vmem:[%s1503_s2 + $0x154] sm:$0xf]  ;;  %v895_v6 = vld [vmem:[%s1503_s2 + $0x44] sm:$0xf] }
  0x1e   :  { %460 = vmatpush.bf16.msra.mxu2 %v770_v25  ;;  %v803_v63 = vld [vmem:[%s1503_s2 + $0x158] sm:$0xf0]  ;;  %v945_v1 = vld [vmem:[%s1503_s2 + $0x1d4] sm:$0xf]  ;;  %v742_v3 = vor.u32 %v913_v59, %v739_v61  ;;  %v667_v7 = vld [vmem:[%s1503_s2 + $0x48] sm:$0xf0] }
  0x1f   :  { %473 = vmatpush.bf16.msra.mxu3 %v834_v26  ;;  %v867_v2 = vld [vmem:[%s1503_s2 + $0x1d8] sm:$0xf0]  ;;  %v806_v4 = vor.u32 %v929_v62, %v803_v63  ;;  %v911_v8 = vld [vmem:[%s1503_s2 + $0xc4] sm:$0xf]  ;;  %v670_v9 = vor.u32 %v895_v6, %v667_v7  ;;  %v731_v10 = vld [vmem:[%s1503_s2 + $0xc8] sm:$0xf0] }
  0x20   :  { %435 = vmatpush.bf16.msra.mxu0 %v634_v33  ;;  %v870_v5 = vor.u32 %v945_v1, %v867_v2  ;;  %v927_v11 = vld [vmem:[%s1503_s2 + $0x144] sm:$0xf]  ;;  %v795_v12 = vld [vmem:[%s1503_s2 + $0x148] sm:$0xf0]  ;;  %v734_v13 = vor.u32 %v911_v8, %v731_v10  ;;  %v893_v18 = vld [vmem:[%s1503_s2 + $0x34] sm:$0xf] }
  0x21   :  { %448 = vmatpush.bf16.msra.mxu1 %v698_v37  ;;  %v798_v14 = vor.u32 %v927_v11, %v795_v12  ;;  %v943_v15 = vld [vmem:[%s1503_s2 + $0x1c4] sm:$0xf]  ;;  %v859_v16 = vld [vmem:[%s1503_s2 + $0x1c8] sm:$0xf0]  ;;  %v659_v19 = vld [vmem:[%s1503_s2 + $0x38] sm:$0xf0] }
  0x22   :  { %461 = vmatpush.bf16.msra.mxu2 %v762_v41  ;;  %v862_v17 = vor.u32 %v943_v15, %v859_v16  ;;  %v909_v20 = vld [vmem:[%s1503_s2 + $0xb4] sm:$0xf]  ;;  %v662_v21 = vor.u32 %v893_v18, %v659_v19  ;;  %v723_v22 = vld [vmem:[%s1503_s2 + $0xb8] sm:$0xf0]  ;;  %v891_v29 = vld [vmem:[%s1503_s2 + $0x24] sm:$0xf] }
  0x23   :  { %474 = vmatpush.bf16.msra.mxu3 %v826_v42  ;;  %v925_v23 = vld [vmem:[%s1503_s2 + $0x134] sm:$0xf]  ;;  %v787_v24 = vld [vmem:[%s1503_s2 + $0x138] sm:$0xf0]  ;;  %v726_v25 = vor.u32 %v909_v20, %v723_v22  ;;  %v651_v31 = vld [vmem:[%s1503_s2 + $0x28] sm:$0xf0] }
  0x24   :  { %480 = vmatpush.bf16.msrb.mxu0 %v694_v38  ;;  %v790_v26 = vor.u32 %v925_v23, %v787_v24  ;;  %v941_v27 = vld [vmem:[%s1503_s2 + $0x1b4] sm:$0xf]  ;;  %v851_v28 = vld [vmem:[%s1503_s2 + $0x1b8] sm:$0xf0]  ;;  %v907_v32 = vld [vmem:[%s1503_s2 + $0xa4] sm:$0xf]  ;;  %v654_v34 = vor.u32 %v891_v29, %v651_v31 }
  0x25   :  { %493 = vmatpush.bf16.msrb.mxu1 %v758_v45  ;;  %v854_v30 = vor.u32 %v941_v27, %v851_v28  ;;  %v715_v33 = vld [vmem:[%s1503_s2 + $0xa8] sm:$0xf0]  ;;  %v923_v36 = vld [vmem:[%s1503_s2 + $0x124] sm:$0xf]  ;;  %v889_v41 = vld [vmem:[%s1503_s2 + $0x14] sm:$0xf] }
  0x26   :  { %506 = vmatpush.bf16.msrb.mxu2 %v822_v46  ;;  %v718_v35 = vor.u32 %v907_v32, %v715_v33  ;;  %v779_v37 = vld [vmem:[%s1503_s2 + $0x128] sm:$0xf0]  ;;  %v939_v38 = vld [vmem:[%s1503_s2 + $0x1a4] sm:$0xf]  ;;  %v643_v42 = vld [vmem:[%s1503_s2 + $0x18] sm:$0xf0] }
  0x27   :  { %519 = vmatpush.bf16.msrb.mxu3 %v886_v48  ;;  %v782_v39 = vor.u32 %v923_v36, %v779_v37  ;;  %v843_v40 = vld [vmem:[%s1503_s2 + $0x1a8] sm:$0xf0]  ;;  %v905_v44 = vld [vmem:[%s1503_s2 + $0x94] sm:$0xf]  ;;  %v707_v45 = vld [vmem:[%s1503_s2 + $0x98] sm:$0xf0]  ;;  %v646_v47 = vor.u32 %v889_v41, %v643_v42 }
  0x28   :  { %481 = vmatpush.bf16.msrb.mxu0 %v686_v52  ;;  %v846_v43 = vor.u32 %v939_v38, %v843_v40  ;;  %v921_v46 = vld [vmem:[%s1503_s2 + $0x114] sm:$0xf]  ;;  %v771_v48 = vld [vmem:[%s1503_s2 + $0x118] sm:$0xf0]  ;;  %v710_v51 = vor.u32 %v905_v44, %v707_v45  ;;  %v887_v53 = vld [vmem:[%s1503_s2 + $0x4] sm:$0xf] }
  0x29   :  { %494 = vmatpush.bf16.msrb.mxu1 %v750_v57  ;;  %v937_v49 = vld [vmem:[%s1503_s2 + $0x194] sm:$0xf]  ;;  %v835_v50 = vld [vmem:[%s1503_s2 + $0x198] sm:$0xf0]  ;;  %v774_v52 = vor.u32 %v921_v46, %v771_v48  ;;  %v635_v54 = vld [vmem:[%s1503_s2 + $0x8] sm:$0xf0] }
  0x2a   :  { %507 = vmatpush.bf16.msrb.mxu2 %v814_v58  ;;  %v903_v55 = vld [vmem:[%s1503_s2 + $0x84] sm:$0xf]  ;;  %v838_v56 = vor.u32 %v937_v49, %v835_v50  ;;  %v699_v57 = vld [vmem:[%s1503_s2 + $0x88] sm:$0xf0]  ;;  %v638_v62 = vor.u32 %v887_v53, %v635_v54  ;;  %v565_v15 = vld [vmem:[%s1505_s5 + $0x78] sm:$0xff] }
  0x2b   :  { %520 = vmatpush.bf16.msrb.mxu3 %v878_v60  ;;  %v919_v58 = vld [vmem:[%s1503_s2 + $0x104] sm:$0xf]  ;;  %v763_v59 = vld [vmem:[%s1503_s2 + $0x108] sm:$0xf0]  ;;  %v702_v63 = vor.u32 %v903_v55, %v699_v57  ;;  %v564_v16 = vld [vmem:[%s1505_s5 + $0x70] sm:$0xff] }
  0x2c   :  { %482 = vmatpush.bf16.msrb.mxu0 %v678_v0  ;;  %v935_v60 = vld [vmem:[%s1503_s2 + $0x184] sm:$0xf]  ;;  %v827_v61 = vld [vmem:[%s1503_s2 + $0x188] sm:$0xf0]  ;;  %v766_v0 = vor.u32 %v919_v58, %v763_v59  ;;  %v561_v19 = vld [vmem:[%s1505_s5 + $0x58] sm:$0xff] }
  0x2d   :  { %495 = vmatpush.bf16.msrb.mxu1 %v742_v3  ;;  %v830_v1 = vor.u32 %v935_v60, %v827_v61  ;;  %v26_v2 = vld [vmem:[%s1504_s0] sm:$0xff]  ;;  %v27_v3 = vld [vmem:[%s1504_s0 + $0x8] sm:$0xff]  ;;  %v560_v20 = vld [vmem:[%s1505_s5 + $0x50] sm:$0xff] }
  0x2e   :  { %508 = vmatpush.bf16.msrb.mxu2 %v806_v4  ;;  %v28_v4 = vld [vmem:[%s1504_s0 + $0x10] sm:$0xff]  ;;  %v562_v18 = vld [vmem:[%s1505_s5 + $0x60] sm:$0xff]  ;;  %v557_v23 = vld [vmem:[%s1505_s5 + $0x38] sm:$0xff] }
  0x2f   :  { %521 = vmatpush.bf16.msrb.mxu3 %v870_v5  ;;  %v29_v5 = vld [vmem:[%s1504_s0 + $0x18] sm:$0xff]  ;;  %v558_v22 = vld [vmem:[%s1505_s5 + $0x40] sm:$0xff]  ;;  %v555_v27 = vld [vmem:[%s1505_s5 + $0x28] sm:$0xff] }
  0x30   :  { %483 = vmatpush.bf16.msrb.mxu0 %v670_v9  ;;  %v581_v24 = vld [vmem:[%s1505_s5 + $0xf8] sm:$0xff]  ;;  %v579_v28 = vld [vmem:[%s1505_s5 + $0xe8] sm:$0xff]  ;;  %v554_v29 = vld [vmem:[%s1505_s5 + $0x20] sm:$0xff] }
  0x31   :  { %496 = vmatpush.bf16.msrb.mxu1 %v734_v13  ;;  %v553_v31 = vld [vmem:[%s1505_s5 + $0x18] sm:$0xff]  ;;  %v552_v33 = vld [vmem:[%s1505_s5 + $0x10] sm:$0xff]  ;;  %v575_v36 = vld [vmem:[%s1505_s5 + $0xc8] sm:$0xff] }
  0x32   :  { %509 = vmatpush.bf16.msrb.mxu2 %v798_v14  ;;  %v577_v32 = vld [vmem:[%s1505_s5 + $0xd8] sm:$0xff]  ;;  %v550_v37 = vld [vmem:[%s1505_s5] sm:$0xff]  ;;  %v572_v40 = vld [vmem:[%s1505_s5 + $0xb0] sm:$0xff] }
  0x33   :  { %522 = vmatpush.bf16.msrb.mxu3 %v862_v17  ;;  %v563_v17 = vld [vmem:[%s1505_s5 + $0x68] sm:$0xff]  ;;  %v574_v38 = vld [vmem:[%s1505_s5 + $0xc0] sm:$0xff]  ;;  %v568_v44 = vld [vmem:[%s1505_s5 + $0x90] sm:$0xff] }
  0x34   :  { %484 = vmatpush.bf16.msrb.mxu0 %v662_v21  ;;  %v559_v21 = vld [vmem:[%s1505_s5 + $0x48] sm:$0xff]  ;;  %v570_v42 = vld [vmem:[%s1505_s5 + $0xa0] sm:$0xff] }
  0x35   :  { %497 = vmatpush.bf16.msrb.mxu1 %v726_v25  ;;  %v556_v25 = vld [vmem:[%s1505_s5 + $0x30] sm:$0xff]  ;;  %v571_v41 = vld [vmem:[%s1505_s5 + $0xa8] sm:$0xff]  ;;  %v566_v48 = vld [vmem:[%s1505_s5 + $0x80] sm:$0xff] }
  0x36   :  { %510 = vmatpush.bf16.msrb.mxu2 %v790_v26  ;;  %v580_v26 = vld [vmem:[%s1505_s5 + $0xf0] sm:$0xff]  ;;  %v567_v45 = vld [vmem:[%s1505_s5 + $0x88] sm:$0xff] }
  0x37   :  { %523 = vmatpush.bf16.msrb.mxu3 %v854_v30  ;;  %v578_v30 = vld [vmem:[%s1505_s5 + $0xe0] sm:$0xff] }
  0x38   :  { %485 = vmatpush.bf16.msrb.mxu0 %v654_v34  ;;  %v576_v34 = vld [vmem:[%s1505_s5 + $0xd0] sm:$0xff] }
  0x39   :  { %498 = vmatpush.bf16.msrb.mxu1 %v718_v35  ;;  %v551_v35 = vld [vmem:[%s1505_s5 + $0x8] sm:$0xff] }
  0x3a   :  { %511 = vmatpush.bf16.msrb.mxu2 %v782_v39  ;;  %v573_v39 = vld [vmem:[%s1505_s5 + $0xb8] sm:$0xff] }
  0x3b   :  { %524 = vmatpush.bf16.msrb.mxu3 %v846_v43  ;;  %v569_v43 = vld [vmem:[%s1505_s5 + $0x98] sm:$0xff] }
  0x3c   :  { %486 = vmatpush.bf16.msrb.mxu0 %v646_v47 }
  0x3d   :  { %499 = vmatpush.bf16.msrb.mxu1 %v710_v51 }
  0x3e   :  { %512 = vmatpush.bf16.msrb.mxu2 %v774_v52  ;;  %v534_v52 = vld [vmem:[%s1507_s3] sm:$0x3] }
  0x3f   :  { %525 = vmatpush.bf16.msrb.mxu3 %v838_v56  ;;  %v542_v56 = vld [vmem:[%s1508_s4] sm:$0x3]  ;;  %v536_v58 = vperm.slane %v534_v52, 0 }
  0x40   :  { %487 = vmatpush.bf16.msrb.mxu0 %v638_v62  ;;  %v544_v60 = vperm.slane %v542_v56, 0 }
  0x41   :  { %500 = vmatpush.bf16.msrb.mxu1 %v702_v63 }
  0x42   :  { %513 = vmatpush.bf16.msrb.mxu2 %v766_v0 }
  0x43   :  { %526 = vmatpush.bf16.msrb.mxu3 %v830_v1 }
  0x74   :  { %v34_v6 = vpop.permute.xlu0 %33 }
  0x75   :  { %v36_v7 = vmul.f32 %v34_v6, %v26_v2  ;;  %v37_v8 = vmul.f32 %v34_v6, %v27_v3  ;;  %v38_v9 = vmul.f32 %v34_v6, %v28_v4  ;;  %v39_v10 = vmul.f32 %v34_v6, %v29_v5 }
  0x77   :  { %v40_v11 = vpack.c.bf16 %v36_v7, %v36_v7  ;;  %v41_v12 = vpack.c.bf16 %v37_v8, %v37_v8  ;;  %v42_v13 = vpack.c.bf16 %v38_v9, %v38_v9  ;;  %v43_v14 = vpack.c.bf16 %v39_v10, %v39_v10 }
  0x78   :  { %v537_v10 = vperm.slane %v534_v52, 1 }
  0x79   :  { %436 = vmatmul.bf16.vlgmr.msra.gmra.mxu0 %v40_v11  ;;  %449 = vmatmul.bf16.vlgmr.msra.gmra.mxu1 %v41_v12 }
  0x7a   :  { %462 = vmatmul.bf16.vlgmr.msra.gmra.mxu2 %v42_v13  ;;  %475 = vmatmul.bf16.vlgmr.msra.gmra.mxu3 %v43_v14 }
  0x7b   :  { %586 = vmatpush.msra.mxu0 %v565_v15  ;;  %606 = vmatpush.msra.mxu1 %v581_v24 }
  0x7d   :  { %587 = vmatpush.msra.mxu0 %v564_v16  ;;  %607 = vmatpush.msra.mxu1 %v580_v26 }
  0x7f   :  { %588 = vmatpush.msra.mxu0 %v563_v17  ;;  %608 = vmatpush.msra.mxu1 %v579_v28  ;;  %v953_v17 = vld [vmem:[%s1506_s6] ss:$0 sm:$0xff] }
  0x81   :  { %589 = vmatpush.msra.mxu0 %v562_v18  ;;  %609 = vmatpush.msra.mxu1 %v578_v30 }
  0x83   :  { %590 = vmatpush.msra.mxu0 %v561_v19  ;;  %610 = vmatpush.msra.mxu1 %v577_v32 }
  0x85   :  { %591 = vmatpush.msra.mxu0 %v560_v20  ;;  %611 = vmatpush.msra.mxu1 %v576_v34 }
  0x87   :  { %592 = vmatpush.msra.mxu0 %v559_v21  ;;  %612 = vmatpush.msra.mxu1 %v575_v36 }
  0x89   :  { %488 = vmatmul.bf16.vlgmr.msrb.gmra.mxu0 %v40_v11  ;;  %501 = vmatmul.bf16.vlgmr.msrb.gmra.mxu1 %v41_v12  ;;  %v545_v12 = vperm.slane %v542_v56, 1 }
  0x8a   :  { %514 = vmatmul.bf16.vlgmr.msrb.gmra.mxu2 %v42_v13  ;;  %527 = vmatmul.bf16.vlgmr.msrb.gmra.mxu3 %v43_v14 }
  0x8b   :  { %593 = vmatpush.msra.mxu0 %v558_v22  ;;  %613 = vmatpush.msra.mxu1 %v574_v38 }
  0x8d   :  { %594 = vmatpush.msra.mxu0 %v557_v23  ;;  %614 = vmatpush.msra.mxu1 %v573_v39 }
  0x8f   :  { %595 = vmatpush.msra.mxu0 %v556_v25  ;;  %615 = vmatpush.msra.mxu1 %v572_v40 }
  0x91   :  { %596 = vmatpush.msra.mxu0 %v555_v27  ;;  %616 = vmatpush.msra.mxu1 %v571_v41 }
  0x93   :  { %597 = vmatpush.msra.mxu0 %v554_v29  ;;  %617 = vmatpush.msra.mxu1 %v570_v42 }
  0x95   :  { %598 = vmatpush.msra.mxu0 %v553_v31  ;;  %618 = vmatpush.msra.mxu1 %v569_v43 }
  0x97   :  { %599 = vmatpush.msra.mxu0 %v552_v33  ;;  %619 = vmatpush.msra.mxu1 %v568_v44 }
  0x99   :  { %600 = vmatpush.msra.mxu0 %v551_v35  ;;  %620 = vmatpush.msra.mxu1 %v567_v45 }
  0x9b   :  { %601 = vmatpush.msra.mxu0 %v550_v37  ;;  %621 = vmatpush.msra.mxu1 %v566_v48 }
  0xf6   :  { %v437_v46 = vpop.f32.mrf.mxu0  ;;  %v450_v47 = vpop.f32.mrf.mxu1 }
  0xf7   :  { %v451_v49 = vadd.f32 %v450_v47, %v437_v46 }
  0xfd   :  { %v463_v50 = vpop.f32.mrf.mxu2  ;;  %v476_v51 = vpop.f32.mrf.mxu3 }
  0xfe   :  { %v464_v53 = vadd.f32 %v463_v50, %v451_v49  ;;  %v439_v54 = vpop.f32.mrf.mxu0  ;;  %v452_v55 = vpop.f32.mrf.mxu1 }
 0x100   :  { %v477_v57 = vadd.f32 %v476_v51, %v464_v53 }
 0x102   :  { %v532_v59 = vmax.f32 %v477_v57, 0.0 }
 0x104   :  { %v540_v61 = vmul.f32 %v536_v58, %v532_v59 }
 0x105   :  { %v465_v62 = vpop.f32.mrf.mxu2  ;;  %v478_v63 = vpop.f32.mrf.mxu3 }
 0x106   :  { %v548_v0 = vadd.f32 %v544_v60, %v540_v61  ;;  %v489_v1 = vpop.f32.mrf.mxu0  ;;  %v502_v2 = vpop.f32.mrf.mxu1 }
 0x107   :  { %v503_v3 = vadd.f32 %v502_v2, %v489_v1 }
 0x108   :  { %602 = vmatmul.f32.vlgmr.msra.gmra.mxu0 %v548_v0 }
 0x10d   :  { %v515_v4 = vpop.f32.mrf.mxu2  ;;  %v528_v5 = vpop.f32.mrf.mxu3 }
 0x10e   :  { %v516_v6 = vadd.f32 %v515_v4, %v503_v3  ;;  %v491_v7 = vpop.f32.mrf.mxu0  ;;  %v504_v8 = vpop.f32.mrf.mxu1 }
 0x110   :  { %v529_v9 = vadd.f32 %v528_v5, %v516_v6 }
 0x112   :  { %v533_v11 = vmax.f32 %v529_v9, 0.0 }
 0x114   :  { %v541_v13 = vmul.f32 %v537_v10, %v533_v11 }
 0x115   :  { %v517_v14 = vpop.f32.mrf.mxu2  ;;  %v530_v15 = vpop.f32.mrf.mxu3 }
 0x116   :  { %v549_v16 = vadd.f32 %v545_v12, %v541_v13 }
 0x118   :  { %622 = vmatmul.f32.vlgmr.msra.gmra.mxu1 %v549_v16 }
 0x185   :  { %v603_v18 = vpop.f32.mrf.mxu0 }
 0x186   :  { %v604_v19 = vadd.f32 %v953_v17, %v603_v18 }
 0x195   :  { %v623_v20 = vpop.f32.mrf.mxu1 }
 0x196   :  { %v624_v21 = vadd.f32 %v623_v20, %v604_v19 }
 0x198   :  { %626 = vst [vmem:[%s1509_s7] sm:$0xff] %v624_v21 }

// kernel: avg_pool_ed_forward.2
= control target key start
LH: loop header
LB: loop body
LE: loop exit
PB: predicated region body
PF: predicated region fallthrough
CT: control target
= control target key end

     0   :  { %vm974_vm1 = vcmask 523264   ;;  %s2076_s1 = inlined_call_operand.vmem [shape: bf16[256,512], index: 1, kind: input, shape index: {}]   ;;  %s2077_s0 = inlined_call_operand.vmem [shape: bf16[64,256], index: 0, kind: input, shape index: {}]   ;;  %s2078_s4 = inlined_call_operand.vmem [shape: s32[1,64], index: 4, kind: input, shape index: {}]   ;;  %s2079_s2 = inlined_call_operand.vmem [shape: f32[1,512], index: 2, kind: input, shape index: {}]   ;;  %s2080_s3 = inlined_call_operand.vmem [shape: f32[1,512], index: 3, kind: input, shape index: {}]   ;;  %s2081_s5 = inlined_call_operand.vmem [shape: f32[1,8,512], index: 5, kind: output, shape index: {}]  }
   0x1   :  { %v1212_v0 = vld [vmem:[%s2076_s1 + $0xe0] sm:$0xf]  ;;  %v1397_v1 = vld [vmem:[%s2076_s1 + $0xec] sm:$0xf0]  ;;  %v1395_v5 = vld [vmem:[%s2076_s1 + $0xe4] sm:$0xf] }
   0x2   :  { %v1340_v2 = vld [vmem:[%s2076_s1 + $0x1e0] sm:$0xf]  ;;  %v1213_v3 = vor.u32 %v1397_v1, %v1212_v0  ;;  %v1429_v4 = vld [vmem:[%s2076_s1 + $0x1ec] sm:$0xf0]  ;;  %v1214_v6 = vld [vmem:[%s2076_s1 + $0xf0] sm:$0xf0] }
   0x3   :  { %v1341_v7 = vor.u32 %v1429_v4, %v1340_v2  ;;  %v1217_v8 = vor.u32 %v1395_v5, %v1214_v6  ;;  %v1427_v9 = vld [vmem:[%s2076_s1 + $0x1e4] sm:$0xf]  ;;  %v1342_v10 = vld [vmem:[%s2076_s1 + $0x1f0] sm:$0xf0]  ;;  %v1196_v11 = vld [vmem:[%s2076_s1 + $0xc0] sm:$0xf] }
   0x4   :  { %520 = vmatpush.bf16.msra.mxu0 %v1213_v3  ;;  %v1345_v12 = vor.u32 %v1427_v9, %v1342_v10  ;;  %v1393_v13 = vld [vmem:[%s2076_s1 + $0xcc] sm:$0xf0]  ;;  %v1324_v14 = vld [vmem:[%s2076_s1 + $0x1c0] sm:$0xf]  ;;  %v1391_v18 = vld [vmem:[%s2076_s1 + $0xc4] sm:$0xf] }
   0x5   :  { %v1425_v15 = vld [vmem:[%s2076_s1 + $0x1cc] sm:$0xf0]  ;;  %549 = vmatpush.bf16.msra.mxu1 %v1341_v7  ;;  %578 = vmatpush.bf16.msra.mxu2 %v1217_v8  ;;  %v1197_v16 = vor.u32 %v1393_v13, %v1196_v11  ;;  %v1198_v19 = vld [vmem:[%s2076_s1 + $0xd0] sm:$0xf0]  ;;  %v1423_v20 = vld [vmem:[%s2076_s1 + $0x1c4] sm:$0xf] }
   0x6   :  { %v1325_v17 = vor.u32 %v1425_v15, %v1324_v14  ;;  %607 = vmatpush.bf16.msra.mxu3 %v1345_v12  ;;  %v1201_v21 = vor.u32 %v1391_v18, %v1198_v19  ;;  %v1326_v22 = vld [vmem:[%s2076_s1 + $0x1d0] sm:$0xf0]  ;;  %v1180_v23 = vld [vmem:[%s2076_s1 + $0xa0] sm:$0xf]  ;;  %v1389_v24 = vld [vmem:[%s2076_s1 + $0xac] sm:$0xf0] }
   0x7   :  { %v1329_v25 = vor.u32 %v1423_v20, %v1326_v22  ;;  %v1308_v26 = vld [vmem:[%s2076_s1 + $0x1a0] sm:$0xf]  ;;  %v1421_v27 = vld [vmem:[%s2076_s1 + $0x1ac] sm:$0xf0]  ;;  %v1387_v28 = vld [vmem:[%s2076_s1 + $0xa4] sm:$0xf]  ;;  %v1181_v29 = vor.u32 %v1389_v24, %v1180_v23 }
   0x8   :  { %521 = vmatpush.bf16.msra.mxu0 %v1197_v16  ;;  %v1182_v30 = vld [vmem:[%s2076_s1 + $0xb0] sm:$0xf0]  ;;  %v1419_v31 = vld [vmem:[%s2076_s1 + $0x1a4] sm:$0xf]  ;;  %v1309_v33 = vor.u32 %v1421_v27, %v1308_v26  ;;  %v1164_v35 = vld [vmem:[%s2076_s1 + $0x80] sm:$0xf] }
   0x9   :  { %v1310_v32 = vld [vmem:[%s2076_s1 + $0x1b0] sm:$0xf0]  ;;  %550 = vmatpush.bf16.msra.mxu1 %v1325_v17  ;;  %579 = vmatpush.bf16.msra.mxu2 %v1201_v21  ;;  %v1185_v34 = vor.u32 %v1387_v28, %v1182_v30  ;;  %v1385_v36 = vld [vmem:[%s2076_s1 + $0x8c] sm:$0xf0]  ;;  %v1292_v37 = vld [vmem:[%s2076_s1 + $0x180] sm:$0xf] }
   0xa   :  { %608 = vmatpush.bf16.msra.mxu3 %v1329_v25  ;;  %v1313_v38 = vor.u32 %v1419_v31, %v1310_v32  ;;  %v1417_v39 = vld [vmem:[%s2076_s1 + $0x18c] sm:$0xf0]  ;;  %v1383_v40 = vld [vmem:[%s2076_s1 + $0x84] sm:$0xf]  ;;  %v1166_v41 = vld [vmem:[%s2076_s1 + $0x90] sm:$0xf0]  ;;  %v1165_v44 = vor.u32 %v1385_v36, %v1164_v35 }
   0xb   :  { %v1415_v42 = vld [vmem:[%s2076_s1 + $0x184] sm:$0xf]  ;;  %v1294_v43 = vld [vmem:[%s2076_s1 + $0x190] sm:$0xf0]  ;;  %v1293_v45 = vor.u32 %v1417_v39, %v1292_v37  ;;  %v1169_v46 = vor.u32 %v1383_v40, %v1166_v41  ;;  %v1148_v47 = vld [vmem:[%s2076_s1 + $0x60] sm:$0xf] }
   0xc   :  { %522 = vmatpush.bf16.msra.mxu0 %v1181_v29  ;;  %v1381_v48 = vld [vmem:[%s2076_s1 + $0x6c] sm:$0xf0]  ;;  %v1276_v49 = vld [vmem:[%s2076_s1 + $0x160] sm:$0xf]  ;;  %v1297_v50 = vor.u32 %v1415_v42, %v1294_v43  ;;  %v1379_v52 = vld [vmem:[%s2076_s1 + $0x64] sm:$0xf] }
   0xd   :  { %551 = vmatpush.bf16.msra.mxu1 %v1309_v33  ;;  %580 = vmatpush.bf16.msra.mxu2 %v1185_v34  ;;  %v1413_v51 = vld [vmem:[%s2076_s1 + $0x16c] sm:$0xf0]  ;;  %v1150_v53 = vld [vmem:[%s2076_s1 + $0x70] sm:$0xf0]  ;;  %v1411_v54 = vld [vmem:[%s2076_s1 + $0x164] sm:$0xf]  ;;  %v1149_v56 = vor.u32 %v1381_v48, %v1148_v47 }
   0xe   :  { %609 = vmatpush.bf16.msra.mxu3 %v1313_v38  ;;  %v1278_v55 = vld [vmem:[%s2076_s1 + $0x170] sm:$0xf0]  ;;  %v1277_v57 = vor.u32 %v1413_v51, %v1276_v49  ;;  %v1153_v58 = vor.u32 %v1379_v52, %v1150_v53  ;;  %v1132_v59 = vld [vmem:[%s2076_s1 + $0x40] sm:$0xf]  ;;  %v1377_v60 = vld [vmem:[%s2076_s1 + $0x4c] sm:$0xf0] }
   0xf   :  { %v1260_v61 = vld [vmem:[%s2076_s1 + $0x140] sm:$0xf]  ;;  %v1281_v62 = vor.u32 %v1411_v54, %v1278_v55  ;;  %v1409_v63 = vld [vmem:[%s2076_s1 + $0x14c] sm:$0xf0]  ;;  %v1375_v0 = vld [vmem:[%s2076_s1 + $0x44] sm:$0xf]  ;;  %v1133_v4 = vor.u32 %v1377_v60, %v1132_v59 }
  0x10   :  { %523 = vmatpush.bf16.msra.mxu0 %v1165_v44  ;;  %v1134_v1 = vld [vmem:[%s2076_s1 + $0x50] sm:$0xf0]  ;;  %v1407_v2 = vld [vmem:[%s2076_s1 + $0x144] sm:$0xf]  ;;  %v1261_v5 = vor.u32 %v1409_v63, %v1260_v61  ;;  %v1116_v7 = vld [vmem:[%s2076_s1 + $0x20] sm:$0xf] }
  0x11   :  { %552 = vmatpush.bf16.msra.mxu1 %v1293_v45  ;;  %581 = vmatpush.bf16.msra.mxu2 %v1169_v46  ;;  %v1262_v3 = vld [vmem:[%s2076_s1 + $0x150] sm:$0xf0]  ;;  %v1137_v6 = vor.u32 %v1375_v0, %v1134_v1  ;;  %v1373_v8 = vld [vmem:[%s2076_s1 + $0x2c] sm:$0xf0]  ;;  %v1244_v9 = vld [vmem:[%s2076_s1 + $0x120] sm:$0xf] }
  0x12   :  { %610 = vmatpush.bf16.msra.mxu3 %v1297_v50  ;;  %v1265_v10 = vor.u32 %v1407_v2, %v1262_v3  ;;  %v1405_v11 = vld [vmem:[%s2076_s1 + $0x12c] sm:$0xf0]  ;;  %v1371_v12 = vld [vmem:[%s2076_s1 + $0x24] sm:$0xf]  ;;  %v1118_v13 = vld [vmem:[%s2076_s1 + $0x30] sm:$0xf0]  ;;  %v1117_v16 = vor.u32 %v1373_v8, %v1116_v7 }
  0x13   :  { %v1403_v14 = vld [vmem:[%s2076_s1 + $0x124] sm:$0xf]  ;;  %v1246_v15 = vld [vmem:[%s2076_s1 + $0x130] sm:$0xf0]  ;;  %v1245_v17 = vor.u32 %v1405_v11, %v1244_v9  ;;  %v1121_v18 = vor.u32 %v1371_v12, %v1118_v13  ;;  %v1100_v19 = vld [vmem:[%s2076_s1] sm:$0xf] }
  0x14   :  { %524 = vmatpush.bf16.msra.mxu0 %v1149_v56  ;;  %v1369_v20 = vld [vmem:[%s2076_s1 + $0xc] sm:$0xf0]  ;;  %v1228_v21 = vld [vmem:[%s2076_s1 + $0x100] sm:$0xf]  ;;  %v1249_v22 = vor.u32 %v1403_v14, %v1246_v15  ;;  %v1367_v24 = vld [vmem:[%s2076_s1 + $0x4] sm:$0xf] }
  0x15   :  { %553 = vmatpush.bf16.msra.mxu1 %v1277_v57  ;;  %582 = vmatpush.bf16.msra.mxu2 %v1153_v58  ;;  %v1401_v23 = vld [vmem:[%s2076_s1 + $0x10c] sm:$0xf0]  ;;  %v1102_v25 = vld [vmem:[%s2076_s1 + $0x10] sm:$0xf0]  ;;  %v1399_v26 = vld [vmem:[%s2076_s1 + $0x104] sm:$0xf]  ;;  %v1101_v28 = vor.u32 %v1369_v20, %v1100_v19 }
  0x16   :  { %611 = vmatpush.bf16.msra.mxu3 %v1281_v62  ;;  %v1230_v27 = vld [vmem:[%s2076_s1 + $0x110] sm:$0xf0]  ;;  %v1068_v29 = vld [vmem:[%s2077_s0] sm:$0xf]  ;;  %v1360_v30 = vld [vmem:[%s2077_s0 + $0x4] sm:$0xf0]  ;;  %v1229_v31 = vor.u32 %v1401_v23, %v1228_v21  ;;  %v1105_v32 = vor.u32 %v1367_v24, %v1102_v25 }
  0x17   :  { %v1359_v33 = vld [vmem:[%s2077_s0 + $0x4] sm:$0xf]  ;;  %v1070_v34 = vld [vmem:[%s2077_s0 + $0x8] sm:$0xf0]  ;;  %v1233_v35 = vor.u32 %v1399_v26, %v1230_v27  ;;  %v1668_v36 = vor.u32 %v1360_v30, %v1068_v29  ;;  %v1220_v38 = vld [vmem:[%s2076_s1 + $0xe8] sm:$0xf] }
  0x18   :  { %525 = vmatpush.bf16.msra.mxu0 %v1133_v4  ;;  %v1670_v37 = vor.u32 %v1359_v33, %v1070_v34  ;;  %v1398_v39 = vld [vmem:[%s2076_s1 + $0xf4] sm:$0xf0]  ;;  %v1348_v40 = vld [vmem:[%s2076_s1 + $0x1e8] sm:$0xf]  ;;  %v1396_v43 = vld [vmem:[%s2076_s1 + $0xec] sm:$0xf] }
  0x19   :  { %554 = vmatpush.bf16.msra.mxu1 %v1261_v5  ;;  %583 = vmatpush.bf16.msra.mxu2 %v1137_v6  ;;  %v1221_v41 = vor.u32 %v1398_v39, %v1220_v38  ;;  %v1430_v42 = vld [vmem:[%s2076_s1 + $0x1f4] sm:$0xf0]  ;;  %v1222_v44 = vld [vmem:[%s2076_s1 + $0xf8] sm:$0xf0]  ;;  %v1428_v47 = vld [vmem:[%s2076_s1 + $0x1ec] sm:$0xf] }
  0x1a   :  { %612 = vmatpush.bf16.msra.mxu3 %v1265_v10  ;;  %v1349_v45 = vor.u32 %v1430_v42, %v1348_v40  ;;  %v1225_v46 = vor.u32 %v1396_v43, %v1222_v44  ;;  %v1350_v48 = vld [vmem:[%s2076_s1 + $0x1f8] sm:$0xf0]  ;;  %v1204_v49 = vld [vmem:[%s2076_s1 + $0xc8] sm:$0xf]  ;;  %v1394_v51 = vld [vmem:[%s2076_s1 + $0xd4] sm:$0xf0] }
  0x1b   :  { %v1353_v50 = vor.u32 %v1428_v47, %v1350_v48  ;;  %v1332_v52 = vld [vmem:[%s2076_s1 + $0x1c8] sm:$0xf]  ;;  %v1426_v53 = vld [vmem:[%s2076_s1 + $0x1d4] sm:$0xf0]  ;;  %v1205_v54 = vor.u32 %v1394_v51, %v1204_v49  ;;  %v1392_v56 = vld [vmem:[%s2076_s1 + $0xcc] sm:$0xf] }
  0x1c   :  { %526 = vmatpush.bf16.msra.mxu0 %v1117_v16  ;;  %v1333_v55 = vor.u32 %v1426_v53, %v1332_v52  ;;  %v1206_v57 = vld [vmem:[%s2076_s1 + $0xd8] sm:$0xf0]  ;;  %v1424_v58 = vld [vmem:[%s2076_s1 + $0x1cc] sm:$0xf]  ;;  %v1188_v61 = vld [vmem:[%s2076_s1 + $0xa8] sm:$0xf] }
  0x1d   :  { %555 = vmatpush.bf16.msra.mxu1 %v1245_v17  ;;  %584 = vmatpush.bf16.msra.mxu2 %v1121_v18  ;;  %v1209_v59 = vor.u32 %v1392_v56, %v1206_v57  ;;  %v1334_v60 = vld [vmem:[%s2076_s1 + $0x1d8] sm:$0xf0]  ;;  %v1390_v62 = vld [vmem:[%s2076_s1 + $0xb4] sm:$0xf0]  ;;  %v1316_v0 = vld [vmem:[%s2076_s1 + $0x1a8] sm:$0xf] }
  0x1e   :  { %613 = vmatpush.bf16.msra.mxu3 %v1249_v22  ;;  %v1337_v63 = vor.u32 %v1424_v58, %v1334_v60  ;;  %v1422_v1 = vld [vmem:[%s2076_s1 + $0x1b4] sm:$0xf0]  ;;  %v1388_v2 = vld [vmem:[%s2076_s1 + $0xac] sm:$0xf]  ;;  %v1189_v3 = vor.u32 %v1390_v62, %v1188_v61  ;;  %v1190_v4 = vld [vmem:[%s2076_s1 + $0xb8] sm:$0xf0] }
  0x1f   :  { %v1420_v5 = vld [vmem:[%s2076_s1 + $0x1ac] sm:$0xf]  ;;  %v1318_v6 = vld [vmem:[%s2076_s1 + $0x1b8] sm:$0xf0]  ;;  %v1076_v7 = vld [vmem:[%s2077_s0 + $0x10] sm:$0xf]  ;;  %v1317_v8 = vor.u32 %v1422_v1, %v1316_v0  ;;  %v1193_v9 = vor.u32 %v1388_v2, %v1190_v4 }
  0x20   :  { %527 = vmatpush.bf16.msra.mxu0 %v1101_v28  ;;  %v1172_v10 = vld [vmem:[%s2076_s1 + $0x88] sm:$0xf]  ;;  %v1386_v11 = vld [vmem:[%s2076_s1 + $0x94] sm:$0xf0]  ;;  %v1321_v13 = vor.u32 %v1420_v5, %v1318_v6  ;;  %v1361_v16 = vld [vmem:[%s2077_s0 + $0x14] sm:$0xf] }
  0x21   :  { %556 = vmatpush.bf16.msra.mxu1 %v1229_v31  ;;  %585 = vmatpush.bf16.msra.mxu2 %v1105_v32  ;;  %v1362_v12 = vld [vmem:[%s2077_s0 + $0x14] sm:$0xf0]  ;;  %v1300_v14 = vld [vmem:[%s2076_s1 + $0x188] sm:$0xf]  ;;  %v1078_v17 = vld [vmem:[%s2077_s0 + $0x18] sm:$0xf0]  ;;  %v1173_v18 = vor.u32 %v1386_v11, %v1172_v10 }
  0x22   :  { %614 = vmatpush.bf16.msra.mxu3 %v1233_v35  ;;  %v1418_v15 = vld [vmem:[%s2076_s1 + $0x194] sm:$0xf0]  ;;  %v1384_v19 = vld [vmem:[%s2076_s1 + $0x8c] sm:$0xf]  ;;  %v1174_v20 = vld [vmem:[%s2076_s1 + $0x98] sm:$0xf0]  ;;  %v1778_v21 = vor.u32 %v1362_v12, %v1076_v7  ;;  %v1786_v25 = vor.u32 %v1361_v16, %v1078_v17 }
  0x23   :  { %528 = vmatmul.bf16.vlgmr.msra.gmra.mxu0 %v1668_v36  ;;  %v1301_v22 = vor.u32 %v1418_v15, %v1300_v14  ;;  %v1416_v23 = vld [vmem:[%s2076_s1 + $0x18c] sm:$0xf]  ;;  %v1302_v24 = vld [vmem:[%s2076_s1 + $0x198] sm:$0xf0]  ;;  %v1177_v26 = vor.u32 %v1384_v19, %v1174_v20  ;;  %v1156_v28 = vld [vmem:[%s2076_s1 + $0x68] sm:$0xf] }
  0x24   :  { %557 = vmatmul.bf16.vlgmr.msra.gmra.mxu1 %v1670_v37  ;;  %586 = vmatmul.bf16.vlgmr.msra.gmra.mxu2 %v1668_v36  ;;  %v1305_v27 = vor.u32 %v1416_v23, %v1302_v24  ;;  %v1382_v29 = vld [vmem:[%s2076_s1 + $0x74] sm:$0xf0]  ;;  %v1284_v30 = vld [vmem:[%s2076_s1 + $0x168] sm:$0xf]  ;;  %v1380_v33 = vld [vmem:[%s2076_s1 + $0x6c] sm:$0xf] }
  0x25   :  { %615 = vmatmul.bf16.vlgmr.msra.gmra.mxu3 %v1670_v37  ;;  %636 = vmatpush.bf16.msrb.mxu0 %v1221_v41  ;;  %v1157_v31 = vor.u32 %v1382_v29, %v1156_v28  ;;  %v1414_v32 = vld [vmem:[%s2076_s1 + $0x174] sm:$0xf0]  ;;  %v1158_v34 = vld [vmem:[%s2076_s1 + $0x78] sm:$0xf0]  ;;  %v1412_v39 = vld [vmem:[%s2076_s1 + $0x16c] sm:$0xf] }
  0x26   :  { %665 = vmatpush.bf16.msrb.mxu1 %v1349_v45  ;;  %694 = vmatpush.bf16.msrb.mxu2 %v1225_v46  ;;  %v1285_v35 = vor.u32 %v1414_v32, %v1284_v30  ;;  %v1161_v38 = vor.u32 %v1380_v33, %v1158_v34  ;;  %v1286_v40 = vld [vmem:[%s2076_s1 + $0x178] sm:$0xf0]  ;;  %v1140_v41 = vld [vmem:[%s2076_s1 + $0x48] sm:$0xf]  ;;  %v1378_v43 = vld [vmem:[%s2076_s1 + $0x54] sm:$0xf0] }
  0x27   :  { %723 = vmatpush.bf16.msrb.mxu3 %v1353_v50  ;;  %v1289_v42 = vor.u32 %v1412_v39, %v1286_v40  ;;  %v1268_v44 = vld [vmem:[%s2076_s1 + $0x148] sm:$0xf]  ;;  %v1410_v45 = vld [vmem:[%s2076_s1 + $0x154] sm:$0xf0]  ;;  %v1141_v46 = vor.u32 %v1378_v43, %v1140_v41  ;;  %v1376_v48 = vld [vmem:[%s2076_s1 + $0x4c] sm:$0xf] }
  0x28   :  { %v1269_v47 = vor.u32 %v1410_v45, %v1268_v44  ;;  %v1142_v49 = vld [vmem:[%s2076_s1 + $0x58] sm:$0xf0]  ;;  %v1408_v50 = vld [vmem:[%s2076_s1 + $0x14c] sm:$0xf]  ;;  %v1124_v52 = vld [vmem:[%s2076_s1 + $0x28] sm:$0xf] }
  0x29   :  { %637 = vmatpush.bf16.msrb.mxu0 %v1205_v54  ;;  %v1270_v51 = vld [vmem:[%s2076_s1 + $0x158] sm:$0xf0]  ;;  %v1374_v53 = vld [vmem:[%s2076_s1 + $0x34] sm:$0xf0]  ;;  %v1145_v54 = vor.u32 %v1376_v48, %v1142_v49  ;;  %v1084_v57 = vld [vmem:[%s2077_s0 + $0x20] sm:$0xf] }
  0x2a   :  { %666 = vmatpush.bf16.msrb.mxu1 %v1333_v55  ;;  %695 = vmatpush.bf16.msrb.mxu2 %v1209_v59  ;;  %v1252_v55 = vld [vmem:[%s2076_s1 + $0x128] sm:$0xf]  ;;  %v1406_v56 = vld [vmem:[%s2076_s1 + $0x134] sm:$0xf0]  ;;  %v1273_v58 = vor.u32 %v1408_v50, %v1270_v51  ;;  %v1125_v59 = vor.u32 %v1374_v53, %v1124_v52  ;;  %v1372_v60 = vld [vmem:[%s2076_s1 + $0x2c] sm:$0xf] }
  0x2b   :  { %724 = vmatpush.bf16.msrb.mxu3 %v1337_v63  ;;  %v1126_v61 = vld [vmem:[%s2076_s1 + $0x38] sm:$0xf0]  ;;  %v1404_v62 = vld [vmem:[%s2076_s1 + $0x12c] sm:$0xf]  ;;  %v1253_v63 = vor.u32 %v1406_v56, %v1252_v55  ;;  %v1108_v1 = vld [vmem:[%s2076_s1 + $0x8] sm:$0xf] }
  0x2c   :  { %v1254_v0 = vld [vmem:[%s2076_s1 + $0x138] sm:$0xf0]  ;;  %v1370_v2 = vld [vmem:[%s2076_s1 + $0x14] sm:$0xf0]  ;;  %v1236_v4 = vld [vmem:[%s2076_s1 + $0x108] sm:$0xf] }
  0x2d   :  { %638 = vmatpush.bf16.msrb.mxu0 %v1189_v3  ;;  %v1364_v3 = vld [vmem:[%s2077_s0 + $0x24] sm:$0xf0]  ;;  %v1402_v5 = vld [vmem:[%s2076_s1 + $0x114] sm:$0xf0]  ;;  %v1363_v6 = vld [vmem:[%s2077_s0 + $0x24] sm:$0xf]  ;;  %v1109_v10 = vor.u32 %v1370_v2, %v1108_v1 }
  0x2e   :  { %667 = vmatpush.bf16.msrb.mxu1 %v1317_v8  ;;  %696 = vmatpush.bf16.msrb.mxu2 %v1193_v9  ;;  %v1086_v7 = vld [vmem:[%s2077_s0 + $0x28] sm:$0xf0]  ;;  %v1129_v8 = vor.u32 %v1372_v60, %v1126_v61  ;;  %v1257_v9 = vor.u32 %v1404_v62, %v1254_v0  ;;  %v1110_v12 = vld [vmem:[%s2076_s1 + $0x18] sm:$0xf0]  ;;  %v1237_v14 = vor.u32 %v1402_v5, %v1236_v4  ;;  %v1092_v20 = vld [vmem:[%s2077_s0 + $0x30] sm:$0xf] }
  0x2f   :  { %725 = vmatpush.bf16.msrb.mxu3 %v1321_v13  ;;  %v1368_v11 = vld [vmem:[%s2076_s1 + $0xc] sm:$0xf]  ;;  %v1085_v13 = vor.u32 %v1364_v3, %v1084_v57  ;;  %v1238_v16 = vld [vmem:[%s2076_s1 + $0x118] sm:$0xf0]  ;;  %v1089_v17 = vor.u32 %v1363_v6, %v1086_v7  ;;  %v1365_v23 = vld [vmem:[%s2077_s0 + $0x34] sm:$0xf] }
  0x30   :  { %v1400_v15 = vld [vmem:[%s2076_s1 + $0x10c] sm:$0xf]  ;;  %v1094_v24 = vld [vmem:[%s2077_s0 + $0x38] sm:$0xf0]  ;;  %v1931_v56 = vld [vmem:[%s2079_s2] sm:$0xf] }
  0x31   :  { %639 = vmatpush.bf16.msrb.mxu0 %v1173_v18  ;;  %v1113_v18 = vor.u32 %v1368_v11, %v1110_v12  ;;  %v1241_v19 = vor.u32 %v1400_v15, %v1238_v16  ;;  %v1934_v0 = vperm.slane %v1931_v56, 0  ;;  %v1939_v1 = vld [vmem:[%s2080_s3] sm:$0xf]  ;;  %v1947_v12 = vperm.slane %v1931_v56, 1 }
  0x32   :  { %668 = vmatpush.bf16.msrb.mxu1 %v1301_v22  ;;  %697 = vmatpush.bf16.msrb.mxu2 %v1177_v26  ;;  %v1366_v22 = vld [vmem:[%s2077_s0 + $0x34] sm:$0xf0]  ;;  %v1944_v11 = vperm.slane %v1939_v1, 0  ;;  %v1950_v15 = vperm.slane %v1939_v1, 1 }
  0x33   :  { %533 = vmatmul.bf16.gmra.mxu0 %v1778_v21  ;;  %726 = vmatpush.bf16.msrb.mxu3 %v1305_v27  ;;  %v1093_v26 = vor.u32 %v1366_v22, %v1092_v20  ;;  %v1097_v27 = vor.u32 %v1365_v23, %v1094_v24 }
  0x34   :  { %562 = vmatmul.bf16.gmra.mxu1 %v1786_v25  ;;  %591 = vmatmul.bf16.gmra.mxu2 %v1778_v21 }
  0x35   :  { %620 = vmatmul.bf16.gmra.mxu3 %v1786_v25  ;;  %640 = vmatpush.bf16.msrb.mxu0 %v1157_v31 }
  0x36   :  { %669 = vmatpush.bf16.msrb.mxu1 %v1285_v35  ;;  %698 = vmatpush.bf16.msrb.mxu2 %v1161_v38 }
  0x37   :  { %727 = vmatpush.bf16.msrb.mxu3 %v1289_v42 }
  0x39   :  { %641 = vmatpush.bf16.msrb.mxu0 %v1141_v46 }
  0x3a   :  { %670 = vmatpush.bf16.msrb.mxu1 %v1269_v47  ;;  %699 = vmatpush.bf16.msrb.mxu2 %v1145_v54 }
  0x3b   :  { %728 = vmatpush.bf16.msrb.mxu3 %v1273_v58 }
  0x3d   :  { %642 = vmatpush.bf16.msrb.mxu0 %v1125_v59 }
  0x3e   :  { %671 = vmatpush.bf16.msrb.mxu1 %v1253_v63  ;;  %700 = vmatpush.bf16.msrb.mxu2 %v1129_v8 }
  0x3f   :  { %729 = vmatpush.bf16.msrb.mxu3 %v1257_v9 }
  0x41   :  { %643 = vmatpush.bf16.msrb.mxu0 %v1109_v10 }
  0x42   :  { %672 = vmatpush.bf16.msrb.mxu1 %v1237_v14  ;;  %701 = vmatpush.bf16.msrb.mxu2 %v1113_v18 }
  0x43   :  { %538 = vmatmul.bf16.gmra.mxu0 %v1085_v13  ;;  %730 = vmatpush.bf16.msrb.mxu3 %v1241_v19 }
  0x44   :  { %567 = vmatmul.bf16.gmra.mxu1 %v1089_v17  ;;  %596 = vmatmul.bf16.gmra.mxu2 %v1085_v13 }
  0x45   :  { %625 = vmatmul.bf16.gmra.mxu3 %v1089_v17 }
  0x53   :  { %543 = vmatmul.bf16.gmra.mxu0 %v1093_v26 }
  0x54   :  { %572 = vmatmul.bf16.gmra.mxu1 %v1097_v27  ;;  %601 = vmatmul.bf16.gmra.mxu2 %v1093_v26 }
  0x55   :  { %630 = vmatmul.bf16.gmra.mxu3 %v1097_v27 }
  0x63   :  { %644 = vmatmul.bf16.vlgmr.msrb.gmra.mxu0 %v1668_v36 }
  0x64   :  { %673 = vmatmul.bf16.vlgmr.msrb.gmra.mxu1 %v1670_v37  ;;  %702 = vmatmul.bf16.vlgmr.msrb.gmra.mxu2 %v1668_v36 }
  0x65   :  { %731 = vmatmul.bf16.vlgmr.msrb.gmra.mxu3 %v1670_v37 }
  0x73   :  { %649 = vmatmul.bf16.gmra.mxu0 %v1778_v21 }
  0x74   :  { %678 = vmatmul.bf16.gmra.mxu1 %v1786_v25  ;;  %707 = vmatmul.bf16.gmra.mxu2 %v1778_v21 }
  0x75   :  { %736 = vmatmul.bf16.gmra.mxu3 %v1786_v25 }
  0x83   :  { %654 = vmatmul.bf16.gmra.mxu0 %v1085_v13 }
  0x84   :  { %683 = vmatmul.bf16.gmra.mxu1 %v1089_v17  ;;  %712 = vmatmul.bf16.gmra.mxu2 %v1085_v13 }
  0x85   :  { %741 = vmatmul.bf16.gmra.mxu3 %v1089_v17 }
  0x93   :  { %659 = vmatmul.bf16.gmra.mxu0 %v1093_v26 }
  0x94   :  { %688 = vmatmul.bf16.gmra.mxu1 %v1097_v27  ;;  %717 = vmatmul.bf16.gmra.mxu2 %v1093_v26 }
  0x95   :  { %746 = vmatmul.bf16.gmra.mxu3 %v1097_v27 }
  0xa0   :  { %v529_v28 = vpop.f32.mrf.mxu0 }
  0xa1   :  { %v558_v36 = vpop.f32.mrf.mxu1 }
  0xa2   :  { %v1920_v29 = vadd.f32 %v558_v36, %v529_v28 }
  0xa7   :  { %v587_v37 = vpop.f32.mrf.mxu2 }
  0xa8   :  { %v616_v30 = vpop.f32.mrf.mxu3  ;;  %v531_v31 = vpop.f32.mrf.mxu0 }
  0xa9   :  { %v1922_v32 = vadd.f32 %v616_v30, %v587_v37  ;;  %v560_v21 = vpop.f32.mrf.mxu1  ;;  %v1956_v30 = vperm.slane %v1931_v56, 2 }
  0xaa   :  { %v561_v2 = vadd.f32 %v560_v21, %v531_v31 }
  0xac   :  { %v855_v16 = vmax.f32 %v561_v2, 0.0 }
  0xaf   :  { %v1924_v33 = vpop.f32.mrf.mxu2 }
  0xb0   :  { %v1926_v25 = vpop.f32.mrf.mxu3  ;;  %v534_v34 = vpop.f32.mrf.mxu0 }
  0xb1   :  { %v563_v35 = vpop.f32.mrf.mxu1 }
  0xb2   :  { %v564_v6 = vadd.f32 %v563_v35, %v534_v34 }
  0xb4   :  { %v859_v23 = vmax.f32 %v564_v6, 0.0 }
  0xb7   :  { %v592_v38 = vpop.f32.mrf.mxu2 }
  0xb8   :  { %v621_v39 = vpop.f32.mrf.mxu3  ;;  %v536_v40 = vpop.f32.mrf.mxu0 }
  0xb9   :  { %v565_v41 = vpop.f32.mrf.mxu1  ;;  %v622_v21 = vadd.f32 %v621_v39, %v592_v38  ;;  %v619_v38 = vadd.f32 %v1926_v25, %v1924_v33  ;;  %v901_v39 = vmul.f32 %v1934_v0, %v859_v23 }
  0xba   :  { %v566_v3 = vadd.f32 %v565_v41, %v536_v40 }
  0xbc   :  { %v863_v17 = vmax.f32 %v566_v3, 0.0  ;;  %v856_v3 = vmax.f32 %v619_v38, 0.0 }
  0xbe   :  { %v905_v41 = vmul.f32 %v1934_v0, %v863_v17 }
  0xbf   :  { %v594_v42 = vpop.f32.mrf.mxu2 }
  0xc0   :  { %v623_v43 = vpop.f32.mrf.mxu3  ;;  %v539_v44 = vpop.f32.mrf.mxu0  ;;  %v947_v33 = vadd.f32 %v1944_v11, %v905_v41 }
  0xc1   :  { %v568_v45 = vpop.f32.mrf.mxu1  ;;  %v624_v34 = vadd.f32 %v623_v43, %v594_v42 }
  0xc2   :  { %v569_v61 = vadd.f32 %v568_v45, %v539_v44 }
  0xc4   :  { %v867_v8 = vmax.f32 %v569_v61, 0.0  ;;  %v1983_v61 = vperm.slane %v1931_v56, 3  ;;  %v1993_v56 = vperm.slane %v1939_v1, 3 }
  0xc6   :  { %v909_v36 = vmul.f32 %v1934_v0, %v867_v8 }
  0xc7   :  { %v597_v46 = vpop.f32.mrf.mxu2 }
  0xc8   :  { %v626_v47 = vpop.f32.mrf.mxu3  ;;  %v541_v48 = vpop.f32.mrf.mxu0  ;;  %v951_v43 = vadd.f32 %v1944_v11, %v909_v36 }
  0xc9   :  { %v570_v49 = vpop.f32.mrf.mxu1  ;;  %v627_v24 = vadd.f32 %v626_v47, %v597_v46  ;;  %v1962_v46 = vperm.slane %v1939_v1, 2  ;;  %v851_v47 = vmax.f32 %v1920_v29, 0.0 }
  0xca   :  { %v571_v57 = vadd.f32 %v570_v49, %v541_v48 }
  0xcb   :  { %v868_v48 = vmax.f32 %v627_v24, 0.0  ;;  %v893_v2 = vmul.f32 %v1934_v0, %v851_v47 }
  0xcc   :  { %v871_v4 = vmax.f32 %v571_v57, 0.0 }
  0xce   :  { %v913_v18 = vmul.f32 %v1934_v0, %v871_v4  ;;  %v943_v4 = vadd.f32 %v1944_v11, %v901_v39 }
  0xcf   :  { %v599_v50 = vpop.f32.mrf.mxu2 }
  0xd0   :  { %v628_v51 = vpop.f32.mrf.mxu3  ;;  %v544_v52 = vpop.f32.mrf.mxu0  ;;  %v955_v45 = vadd.f32 %v1944_v11, %v913_v18 }
  0xd1   :  { %v573_v53 = vpop.f32.mrf.mxu1  ;;  %v629_v13 = vadd.f32 %v628_v51, %v599_v50  ;;  %v864_v51 = vmax.f32 %v624_v34, 0.0 }
  0xd2   :  { %v574_v54 = vadd.f32 %v573_v53, %v544_v52 }
  0xd3   :  { %v872_v35 = vmax.f32 %v629_v13, 0.0 }
  0xd4   :  { %v875_v62 = vmax.f32 %v574_v54, 0.0  ;;  %v897_v54 = vmul.f32 %v1934_v0, %v855_v16  ;;  %v898_v16 = vmul.f32 %v1947_v12, %v856_v3 }
  0xd5   :  { %v914_v52 = vmul.f32 %v1947_v12, %v872_v35 }
  0xd6   :  { %v917_v9 = vmul.f32 %v1934_v0, %v875_v62  ;;  %v939_v8 = vadd.f32 %v1944_v11, %v897_v54  ;;  %v940_v23 = vadd.f32 %v1950_v15, %v898_v16 }
  0xd7   :  { %v602_v55 = vpop.f32.mrf.mxu2 }
  0xd8   :  { %v631_v58 = vpop.f32.mrf.mxu3  ;;  %v546_v59 = vpop.f32.mrf.mxu0  ;;  %v959_v31 = vadd.f32 %v1944_v11, %v917_v9  ;;  %v852_v9 = vmax.f32 %v1922_v32, 0.0 }
  0xd9   :  { %v575_v60 = vpop.f32.mrf.mxu1  ;;  %v632_v7 = vadd.f32 %v631_v58, %v602_v55  ;;  %v860_v55 = vmax.f32 %v622_v21, 0.0 }
  0xda   :  { %v576_v63 = vadd.f32 %v575_v60, %v546_v59  ;;  %v910_v59 = vmul.f32 %v1947_v12, %v868_v48 }
  0xdb   :  { %v876_v26 = vmax.f32 %v632_v7, 0.0  ;;  %v956_v7 = vadd.f32 %v1950_v15, %v914_v52 }
  0xdc   :  { %v879_v5 = vmax.f32 %v576_v63, 0.0  ;;  %v952_v13 = vadd.f32 %v1950_v15, %v910_v59 }
  0xdd   :  { %v918_v49 = vmul.f32 %v1947_v12, %v876_v26 }
  0xde   :  { %v921_v10 = vmul.f32 %v1934_v0, %v879_v5  ;;  %v906_v5 = vmul.f32 %v1947_v12, %v864_v51  ;;  %v902_v0 = vmul.f32 %v1947_v12, %v860_v55 }
  0xdf   :  { %v604_v14 = vpop.f32.mrf.mxu2  ;;  %v960_v63 = vadd.f32 %v1950_v15, %v918_v49  ;;  %v967_v49 = vlaneseq }
  0xe0   :  { %v963_v19 = vadd.f32 %v1944_v11, %v921_v10  ;;  %v633_v20 = vpop.f32.mrf.mxu3  ;;  %v645_v22 = vpop.f32.mrf.mxu0  ;;  %v948_v17 = vadd.f32 %v1950_v15, %v906_v5 }
  0xe1   :  { %v634_v27 = vadd.f32 %v633_v20, %v604_v14  ;;  %v674_v28 = vpop.f32.mrf.mxu1  ;;  %v935_v14 = vadd.f32 %v1944_v11, %v893_v2  ;;  %v894_v20 = vmul.f32 %v1947_v12, %v852_v9  ;;  %v944_v11 = vadd.f32 %v1950_v15, %v902_v0 }
  0xe2   :  { %v675_v37 = vadd.f32 %v674_v28, %v645_v22  ;;  %986 = vmatpush.msra.mxu0 %v963_v19 }
  0xe3   :  { %v880_v40 = vmax.f32 %v634_v27, 0.0  ;;  %v936_v24 = vadd.f32 %v1950_v15, %v894_v20 }
  0xe4   :  { %v853_v44 = vmax.f32 %v675_v37, 0.0  ;;  %987 = vmatpush.msra.mxu0 %v959_v31 }
  0xe5   :  { %v922_v50 = vmul.f32 %v1947_v12, %v880_v40 }
  0xe6   :  { %v895_v42 = vmul.f32 %v1956_v30, %v853_v44  ;;  %988 = vmatpush.msra.mxu0 %v955_v45 }
  0xe7   :  { %v964_v29 = vadd.f32 %v1950_v15, %v922_v50  ;;  %v703_v53 = vpop.f32.mrf.mxu2  ;;  %v968_v15 = vshrl.u32 %v967_v49, 7  ;;  %v1432_v50 = vld [vmem:[%s2078_s4] ss:$0 sm:$0xff] }
  0xe8   :  { %v732_v57 = vpop.f32.mrf.mxu3  ;;  %989 = vmatpush.msra.mxu0 %v951_v43  ;;  %v1975_v58 = vpop.f32.mrf.mxu0  ;;  %v1979_v25 = vadd.f32 %v1962_v46, %v895_v42  ;;  %v1433_v42 = vmov 0.0  }
  0xe9   :  { %v733_v60 = vadd.f32 %v732_v57, %v703_v53  ;;  %1006 = vmatpush.msra.mxu1 %v964_v29  ;;  %v1985_v62 = vpop.f32.mrf.mxu1  ;;  %vm971_vm0 = vcmp.eq.s32.totalorder %v968_v15, %v1432_v50 }
  0xea   :  { %990 = vmatpush.msra.mxu0 %v947_v33  ;;  %v2019_v43 = vsel %vm971_vm0, 1.0, %v1433_v42 }
  0xeb   :  { %v854_v6 = vmax.f32 %v733_v60, 0.0  ;;  %1007 = vmatpush.msra.mxu1 %v960_v63 }
  0xec   :  { %991 = vmatpush.msra.mxu0 %v943_v4 }
  0xed   :  { %v896_v10 = vmul.f32 %v1983_v61, %v854_v6  ;;  %1008 = vmatpush.msra.mxu1 %v956_v7 }
  0xee   :  { %992 = vmatpush.msra.mxu0 %v939_v8  ;;  %v677_v8 = vadd.f32 %v1985_v62, %v1975_v58 }
  0xef   :  { %1009 = vmatpush.msra.mxu1 %v952_v13  ;;  %v2002_v1 = vpop.f32.mrf.mxu2  ;;  %v2006_v18 = vadd.f32 %v1993_v56, %v896_v10 }
  0xf0   :  { %v2008_v32 = vpop.f32.mrf.mxu3  ;;  %993 = vmatpush.msra.mxu0 %v935_v14  ;;  %v650_v19 = vpop.f32.mrf.mxu0 }
  0xf1   :  { %1010 = vmatpush.msra.mxu1 %v948_v17  ;;  %v679_v22 = vpop.f32.mrf.mxu1  ;;  %1355 = vmatmul.msk.f32.vlgmr.msra.gmra.mxu0 %vm974_vm1, %v2019_v43 }
  0xf2   :  { %v680_v2 = vadd.f32 %v679_v22, %v650_v19 }
  0xf3   :  { %1011 = vmatpush.msra.mxu1 %v944_v11 }
  0xf4   :  { %v861_v19 = vmax.f32 %v680_v2, 0.0 }
  0xf5   :  { %1012 = vmatpush.msra.mxu1 %v940_v23 }
  0xf7   :  { %1013 = vmatpush.msra.mxu1 %v936_v24  ;;  %v2014_v26 = vpop.f32.mrf.mxu2 }
  0xf8   :  { %v737_v27 = vpop.f32.mrf.mxu3  ;;  %v652_v28 = vpop.f32.mrf.mxu0  ;;  %1356 = vmatmul.msk.f32.vlgmr.msra.gmra.mxu1 %vm974_vm1, %v2019_v43 }
  0xf9   :  { %v681_v36 = vpop.f32.mrf.mxu1 }
  0xfa   :  { %v682_v33 = vadd.f32 %v681_v36, %v652_v28  ;;  %v857_v28 = vmax.f32 %v677_v8, 0.0  ;;  %v738_v36 = vadd.f32 %v737_v27, %v2014_v26 }
  0xfc   :  { %v865_v9 = vmax.f32 %v682_v33, 0.0  ;;  %v899_v26 = vmul.f32 %v1956_v30, %v857_v28 }
  0xfe   :  { %v907_v58 = vmul.f32 %v1956_v30, %v865_v9 }
  0xff   :  { %v710_v37 = vpop.f32.mrf.mxu2 }
 0x100   :  { %v739_v31 = vpop.f32.mrf.mxu3  ;;  %v655_v21 = vpop.f32.mrf.mxu0  ;;  %v949_v27 = vadd.f32 %v1962_v46, %v907_v58 }
 0x101   :  { %v684_v12 = vpop.f32.mrf.mxu1  ;;  %v740_v11 = vadd.f32 %v739_v31, %v710_v37  ;;  %v735_v31 = vadd.f32 %v2008_v32, %v2002_v1 }
 0x102   :  { %v685_v54 = vadd.f32 %v684_v12, %v655_v21 }
 0x103   :  { %v858_v1 = vmax.f32 %v735_v31, 0.0 }
 0x104   :  { %v869_v3 = vmax.f32 %v685_v54, 0.0 }
 0x106   :  { %v911_v20 = vmul.f32 %v1956_v30, %v869_v3 }
 0x107   :  { %v713_v34 = vpop.f32.mrf.mxu2 }
 0x108   :  { %v742_v35 = vpop.f32.mrf.mxu3  ;;  %v657_v40 = vpop.f32.mrf.mxu0  ;;  %v953_v37 = vadd.f32 %v1962_v46, %v911_v20 }
 0x109   :  { %v686_v41 = vpop.f32.mrf.mxu1  ;;  %v743_v14 = vadd.f32 %v742_v35, %v713_v34  ;;  %v903_v35 = vmul.f32 %v1956_v30, %v861_v19 }
 0x10a   :  { %v687_v51 = vadd.f32 %v686_v41, %v657_v40  ;;  %v866_v40 = vmax.f32 %v740_v11, 0.0 }
 0x10b   :  { %v870_v21 = vmax.f32 %v743_v14, 0.0  ;;  %v945_v49 = vadd.f32 %v1962_v46, %v903_v35 }
 0x10c   :  { %v873_v59 = vmax.f32 %v687_v51, 0.0  ;;  %v908_v32 = vmul.f32 %v1983_v61, %v866_v40 }
 0x10e   :  { %v915_v0 = vmul.f32 %v1956_v30, %v873_v59  ;;  %v950_v42 = vadd.f32 %v1993_v56, %v908_v32 }
 0x10f   :  { %v715_v44 = vpop.f32.mrf.mxu2 }
 0x110   :  { %v744_v45 = vpop.f32.mrf.mxu3  ;;  %v660_v47 = vpop.f32.mrf.mxu0  ;;  %v957_v62 = vadd.f32 %v1962_v46, %v915_v0 }
 0x111   :  { %v689_v48 = vpop.f32.mrf.mxu1  ;;  %v745_v6 = vadd.f32 %v744_v45, %v715_v44  ;;  %v862_v45 = vmax.f32 %v738_v36, 0.0 }
 0x112   :  { %v690_v38 = vadd.f32 %v689_v48, %v660_v47  ;;  %v912_v47 = vmul.f32 %v1983_v61, %v870_v21 }
 0x113   :  { %v874_v23 = vmax.f32 %v745_v6, 0.0  ;;  %v904_v50 = vmul.f32 %v1983_v61, %v862_v45 }
 0x114   :  { %v877_v55 = vmax.f32 %v690_v38, 0.0  ;;  %v954_v38 = vadd.f32 %v1993_v56, %v912_v47 }
 0x115   :  { %v916_v41 = vmul.f32 %v1983_v61, %v874_v23  ;;  %v946_v51 = vadd.f32 %v1993_v56, %v904_v50 }
 0x116   :  { %v919_v4 = vmul.f32 %v1956_v30, %v877_v55 }
 0x117   :  { %v718_v39 = vpop.f32.mrf.mxu2  ;;  %v958_v15 = vadd.f32 %v1993_v56, %v916_v41 }
 0x118   :  { %v747_v52 = vpop.f32.mrf.mxu3  ;;  %v662_v29 = vpop.f32.mrf.mxu0  ;;  %v961_v22 = vadd.f32 %v1962_v46, %v919_v4 }
 0x119   :  { %v691_v53 = vpop.f32.mrf.mxu1  ;;  %v748_v63 = vadd.f32 %v747_v52, %v718_v39  ;;  %v900_v39 = vmul.f32 %v1983_v61, %v858_v1 }
 0x11a   :  { %v692_v57 = vadd.f32 %v691_v53, %v662_v29 }
 0x11b   :  { %v878_v16 = vmax.f32 %v748_v63, 0.0 }
 0x11c   :  { %v881_v60 = vmax.f32 %v692_v57, 0.0 }
 0x11d   :  { %v920_v12 = vmul.f32 %v1983_v61, %v878_v16 }
 0x11e   :  { %v923_v5 = vmul.f32 %v1956_v30, %v881_v60  ;;  %v941_v30 = vadd.f32 %v1962_v46, %v899_v26 }
 0x11f   :  { %v720_v7 = vpop.f32.mrf.mxu2  ;;  %v962_v48 = vadd.f32 %v1993_v56, %v920_v12 }
 0x120   :  { %v965_v10 = vadd.f32 %v1962_v46, %v923_v5  ;;  %v749_v13 = vpop.f32.mrf.mxu3  ;;  %v942_v46 = vadd.f32 %v1993_v56, %v900_v39 }
 0x121   :  { %v750_v17 = vadd.f32 %v749_v13, %v720_v7 }
 0x122   :  { %1026 = vmatpush.msra.mxu2 %v965_v10 }
 0x123   :  { %v882_v24 = vmax.f32 %v750_v17, 0.0 }
 0x124   :  { %1027 = vmatpush.msra.mxu2 %v961_v22 }
 0x125   :  { %v924_v34 = vmul.f32 %v1983_v61, %v882_v24 }
 0x126   :  { %1028 = vmatpush.msra.mxu2 %v957_v62 }
 0x127   :  { %v966_v44 = vadd.f32 %v1993_v56, %v924_v34 }
 0x128   :  { %1029 = vmatpush.msra.mxu2 %v953_v37 }
 0x129   :  { %1046 = vmatpush.msra.mxu3 %v966_v44 }
 0x12a   :  { %1030 = vmatpush.msra.mxu2 %v949_v27 }
 0x12b   :  { %1047 = vmatpush.msra.mxu3 %v962_v48 }
 0x12c   :  { %1031 = vmatpush.msra.mxu2 %v945_v49 }
 0x12d   :  { %1048 = vmatpush.msra.mxu3 %v958_v15 }
 0x12e   :  { %1032 = vmatpush.msra.mxu2 %v941_v30 }
 0x12f   :  { %1049 = vmatpush.msra.mxu3 %v954_v38 }
 0x130   :  { %1033 = vmatpush.msra.mxu2 %v1979_v25 }
 0x131   :  { %1050 = vmatpush.msra.mxu3 %v950_v42  ;;  %1357 = vmatmul.msk.f32.vlgmr.msra.gmra.mxu2 %vm974_vm1, %v2019_v43 }
 0x133   :  { %1051 = vmatpush.msra.mxu3 %v946_v51 }
 0x135   :  { %1052 = vmatpush.msra.mxu3 %v942_v46 }
 0x137   :  { %1053 = vmatpush.msra.mxu3 %v2006_v18 }
 0x138   :  { %1358 = vmatmul.msk.f32.vlgmr.msra.gmra.mxu3 %vm974_vm1, %v2019_v43 }
 0x16e   :  { %v995_v61 = vpop.f32.mrf.mxu0 }
 0x16f   :  { %1058 = vst [vmem:[%s2081_s5] sm:$0xff] %v995_v61 }
 0x175   :  { %v1015_v52 = vpop.f32.mrf.mxu1 }
 0x176   :  { %1059 = vst [vmem:[%s2081_s5 + $0x8] sm:$0xff] %v1015_v52 }
 0x1b4   :  { %v1035_v25 = vpop.f32.mrf.mxu2 }
 0x1b5   :  { %1060 = vst [vmem:[%s2081_s5 + $0x10] sm:$0xff] %v1035_v25 }
 0x1bb   :  { %v1055_v56 = vpop.f32.mrf.mxu3 }
 0x1bc   :  { %1061 = vst [vmem:[%s2081_s5 + $0x18] sm:$0xff] %v1055_v56 }

</bundles_post_ra>
